<compile_context>
chip_gen: v7x
topology: tpu7x:2x2x1
jax: 0.10.0
libtpu: 0.0.40
codegen_flags: <defaults>
</compile_context>

<pallas_src>
import math

import jax
import jax.numpy as jnp
from jax.experimental import pallas as pl
from jax.experimental.pallas import tpu as pltpu

# ----------------------------- configuration -----------------------------
B = 2            # batch
S = 8            # sequence length  (original model: 830)
VOCAB = 100      # vocab size
E = 32           # embed_size
H = 32           # hidden_size
UA = 768         # roberta pooled dim
NH = 2           # attention heads
F = H * (S + 1)  # concat feature dim (original: hidden_size * 831)
PAD_IDX = 0
BN_EPS = 1e-5
LANES = 128      # packed-slab lane width

# ------------------------ packed parameter layout -------------------------
# All weights are stored pre-transposed to (in, out), padded to 128 lanes and
# stacked along the sublane axis of one slab; all row counts are multiples of
# 8 so every static slice is sublane-aligned.
_W_ENTRIES = [
    ("w_in1", (E, 3 * E)),
    ("w_out1", (E, E)),
    ("w_l1", (E, H)),
    ("w_in2", (H, 3 * H)),
    ("w_out2", (H, H)),
    ("w_l2", (H, H)),
    ("w_ua", (UA, H)),
    ("w_h_ua", (H, H)),       # BN-folded hidden weight, UA rows
    ("w_h_tls", (S * H, H)),  # BN-folded hidden weight, flattened-tls rows
    ("w_c", (H, 1)),
]
W_OFF = {}
W_SHAPES = dict(_W_ENTRIES)
_r = 0
for _name, _shp in _W_ENTRIES:
    W_OFF[_name] = _r
    _r += _shp[0]
WSLAB_ROWS = _r

_B_ENTRIES = ["b_in1", "b_out1", "b_l1", "b_in2", "b_out2", "b_l2",
              "b_ua", "b_h", "b_c"]
B_ROW = {name: i for i, name in enumerate(_B_ENTRIES)}
B_WIDTH = {"b_in1": 3 * E, "b_out1": E, "b_l1": H, "b_in2": 3 * H,
           "b_out2": H, "b_l2": H, "b_ua": H, "b_h": H, "b_c": 1}
BSLAB_ROWS = len(_B_ENTRIES)


# ----------------------------- kernel helpers -----------------------------
def _wload(wref, name):
    r0 = W_OFF[name]
    rows, cols = W_SHAPES[name]
    return wref[r0:r0 + rows, 0:cols]


def _bload(bref, name):
    r = B_ROW[name]
    return bref[r:r + 1, 0:B_WIDTH[name]]


def _mha(x, w_in, b_in, w_out, b_out, num_heads):
    """PyTorch-style self MultiheadAttention on one (S, D) slab.

    Per-head output projection is decomposed (o_h @ w_out[h*hd:(h+1)*hd, :])
    so no concatenate-over-heads relayout is needed.
    """
    _, d = x.shape
    hd = d // num_heads
    scale = 1.0 / math.sqrt(hd)
    qkv = jnp.dot(x, w_in, preferred_element_type=jnp.float32) + b_in  # (S, 3d)
    acc = None
    for h in range(num_heads):
        q = qkv[:, h * hd:(h + 1) * hd] * scale
        k = qkv[:, d + h * hd:d + (h + 1) * hd]
        v = qkv[:, 2 * d + h * hd:2 * d + (h + 1) * hd]
        sc = jax.lax.dot_general(q, k, (((1,), (1,)), ((), ())),
                                 preferred_element_type=jnp.float32)   # (S, S)
        sc = sc - jnp.max(sc, axis=-1, keepdims=True)
        p = jnp.exp(sc)
        p = p * pl.reciprocal(jnp.sum(p, axis=-1, keepdims=True), approx=True)
        o_h = jnp.dot(p, v, preferred_element_type=jnp.float32)        # (S, hd)
        contrib = jnp.dot(o_h, w_out[h * hd:(h + 1) * hd, :],
                          preferred_element_type=jnp.float32)          # (S, d)
        acc = contrib if acc is None else acc + contrib
    return acc + b_out


# ------------------------------ fused kernel ------------------------------
def fused_kernel(ids_ref, ua_ref, emb_ref, wslab_ref, bslab_ref, out_ref):
    # static (zero-cost) views into the packed slabs
    w_in1 = _wload(wslab_ref, "w_in1"); b_in1 = _bload(bslab_ref, "b_in1")
    w_out1 = _wload(wslab_ref, "w_out1"); b_out1 = _bload(bslab_ref, "b_out1")
    w_l1 = _wload(wslab_ref, "w_l1"); b_l1 = _bload(bslab_ref, "b_l1")
    w_in2 = _wload(wslab_ref, "w_in2"); b_in2 = _bload(bslab_ref, "b_in2")
    w_out2 = _wload(wslab_ref, "w_out2"); b_out2 = _bload(bslab_ref, "b_out2")
    w_l2 = _wload(wslab_ref, "w_l2"); b_l2 = _bload(bslab_ref, "b_l2")
    w_ua = _wload(wslab_ref, "w_ua"); b_ua = _bload(bslab_ref, "b_ua")
    w_h_ua = _wload(wslab_ref, "w_h_ua")
    b_h = _bload(bslab_ref, "b_h")          # BN already folded in
    w_c = _wload(wslab_ref, "w_c"); b_c = _bload(bslab_ref, "b_c")

    # linearUA for the whole batch in one dot
    ua_p = jnp.dot(ua_ref[...], w_ua,
                   preferred_element_type=jnp.float32) + b_ua          # (B, H)

    tls_base = W_OFF["w_h_tls"]
    hidden_rows = []
    for b in range(B):  # B=2, unrolled: single grid step, no per-step overhead
        # in-kernel embedding gather (padding_idx row is zero in the table)
        rows = [emb_ref[pl.ds(ids_ref[b, s], 1), :] for s in range(S)]
        x = jnp.concatenate(rows, axis=0)                              # (S, E)

        h1 = _mha(x, w_in1, b_in1, w_out1, b_out1, NH)                 # (S, E)
        h1 = jnp.maximum(h1, 0.0)
        h1 = jnp.dot(h1, w_l1, preferred_element_type=jnp.float32) + b_l1
        h1 = jnp.maximum(h1, 0.0)                                      # (S, H)

        h2 = _mha(h1, w_in2, b_in2, w_out2, b_out2, NH)                # (S, H)
        h2 = jnp.maximum(h2, 0.0)
        h2 = jnp.dot(h2, w_l2, preferred_element_type=jnp.float32) + b_l2

        # hidden Linear, decomposed: ua_p @ W_ua + sum_s h2[s] @ W_tls[s]
        # (equivalent to concat+flatten @ w_h; matches batch-first flatten
        #  order of torch.flatten(tls.transpose(0,1), start_dim=1))
        acc = jnp.dot(ua_p[b:b + 1, :], w_h_ua,
                      preferred_element_type=jnp.float32)              # (1, H)
        for s in range(S):
            w_s = wslab_ref[tls_base + s * H: tls_base + (s + 1) * H, 0:H]
            acc = acc + jnp.dot(h2[s:s + 1, :], w_s,
                                preferred_element_type=jnp.float32)
        hidden_rows.append(acc)

    hidden = jnp.concatenate(hidden_rows, axis=0) + b_h                # (B, H)
    hidden = jnp.maximum(hidden, 0.0)                                  # BN+ReLU
    out_ref[...] = jnp.dot(hidden, w_c,
                           preferred_element_type=jnp.float32) + b_c   # (B, 1)


# ------------------------------ host wrapper ------------------------------
def model_forward(token_ids, ua_pooled, packed):
    return pl.pallas_call(
        fused_kernel,
        out_shape=jax.ShapeDtypeStruct((B, 1), jnp.float32),
        in_specs=[
            pl.BlockSpec(memory_space=pltpu.MemorySpace.SMEM),   # token ids
            pl.BlockSpec(memory_space=pltpu.MemorySpace.VMEM),   # ua pooled
            pl.BlockSpec(memory_space=pltpu.MemorySpace.VMEM),   # emb table
            pl.BlockSpec(memory_space=pltpu.MemorySpace.VMEM),   # weight slab
            pl.BlockSpec(memory_space=pltpu.MemorySpace.VMEM),   # bias slab
        ],
        out_specs=pl.BlockSpec(memory_space=pltpu.MemorySpace.VMEM),
    )(token_ids, ua_pooled,
      packed["emb_table"], packed["wslab"], packed["bslab"])


def pack_params(params):
    """Fold BatchNorm into the hidden Linear and pack params into two slabs."""
    g = params["bn_gamma"] / jnp.sqrt(params["bn_var"] + BN_EPS)       # (1, H)
    w_h_f = params["w_h"] * g                                          # (F, H)
    b_h_f = (params["b_h"] - params["bn_mean"]) * g + params["bn_beta"]

    weights = dict(
        w_in1=params["w_in1"], w_out1=params["w_out1"], w_l1=params["w_l1"],
        w_in2=params["w_in2"], w_out2=params["w_out2"], w_l2=params["w_l2"],
        w_ua=params["w_ua"],
        w_h_ua=w_h_f[:H, :], w_h_tls=w_h_f[H:, :],
        w_c=params["w_c"],
    )
    wslab = jnp.zeros((WSLAB_ROWS, LANES), jnp.float32)
    for name, _ in _W_ENTRIES:
        w = weights[name]
        r0 = W_OFF[name]
        wslab = wslab.at[r0:r0 + w.shape[0], :w.shape[1]].set(w)

    biases = dict(
        b_in1=params["b_in1"], b_out1=params["b_out1"], b_l1=params["b_l1"],
        b_in2=params["b_in2"], b_out2=params["b_out2"], b_l2=params["b_l2"],
        b_ua=params["b_ua"], b_h=b_h_f, b_c=params["b_c"],
    )
    bslab = jnp.zeros((BSLAB_ROWS, LANES), jnp.float32)
    for name in _B_ENTRIES:
        bvec = biases[name].reshape(1, -1)
        bslab = bslab.at[B_ROW[name]:B_ROW[name] + 1, :bvec.shape[1]].set(bvec)

    return dict(emb_table=params["emb_table"], wslab=wslab, bslab=bslab)


# ------------------------------ parameters --------------------------------
def init_params(key):
    ks = iter(jax.random.split(key, 32))

    def rnd(shape, scale=0.05):
        return (scale * jax.random.normal(next(ks), shape)).astype(jnp.float32)

    emb_table = rnd((VOCAB, E))
    emb_table = emb_table.at[PAD_IDX].set(0.0)                 # padding_idx

    return dict(
        emb_table=emb_table,
        # attention1 (weights stored pre-transposed to (in, out))
        w_in1=rnd((E, 3 * E)), b_in1=rnd((1, 3 * E)),
        w_out1=rnd((E, E)), b_out1=rnd((1, E)),
        # linear1
        w_l1=rnd((E, H)), b_l1=rnd((1, H)),
        # attention2
        w_in2=rnd((H, 3 * H)), b_in2=rnd((1, 3 * H)),
        w_out2=rnd((H, H)), b_out2=rnd((1, H)),
        # linear2
        w_l2=rnd((H, H)), b_l2=rnd((1, H)),
        # linearUA
        w_ua=rnd((UA, H)), b_ua=rnd((1, H)),
        # hidden: Linear(F, H) + BatchNorm1d(H) (running stats, eval mode)
        w_h=rnd((F, H)), b_h=rnd((1, H)),
        bn_gamma=jnp.ones((1, H), jnp.float32),
        bn_beta=jnp.zeros((1, H), jnp.float32),
        bn_mean=jnp.zeros((1, H), jnp.float32),
        bn_var=jnp.ones((1, H), jnp.float32),
        # clf
        w_c=rnd((H, 1)), b_c=rnd((1, 1)),
    )


# ---------------------------------- main -----------------------------------
if __name__ == "__main__":
    key = jax.random.PRNGKey(0)
    k_param, k_tok, k_ua = jax.random.split(key, 3)

    params = init_params(k_param)
    packed = pack_params(params)            # host-side fold + pack (once)

    token_ids = jax.random.randint(k_tok, (B, S), 0, VOCAB, dtype=jnp.int32)
    ua_pooled = jax.random.normal(k_ua, (B, UA), dtype=jnp.float32)

    out = jax.jit(model_forward)(token_ids, ua_pooled, packed)
    out = jax.block_until_ready(out)
    assert out.shape == (B, 1) and out.dtype == jnp.float32
    print("KERNEL_OK")
</pallas_src>

<mosaic_0001>
module attributes {stable_mosaic.version = 11 : i64} {
  func.func @fused_kernel(%arg0: memref<2x8xi32, #tpu.memory_space<smem>>, %arg1: memref<2x768xf32, #tpu.memory_space<vmem>>, %arg2: memref<100x32xf32, #tpu.memory_space<vmem>>, %arg3: memref<1280x128xf32, #tpu.memory_space<vmem>>, %arg4: memref<9x128xf32, #tpu.memory_space<vmem>>, %arg5: memref<2x1xf32, #tpu.memory_space<vmem>>) attributes {dimension_semantics = [], scalar_prefetch = 0 : i64, scratch_operands = 0 : i64, tpu.core_type = #tpu.core_type<tc>} {
    %c0 = arith.constant 0 : index
    %c0_0 = arith.constant 0 : index
    %0 = vector.load %arg3[%c0, %c0_0] : memref<1280x128xf32, #tpu.memory_space<vmem>>, vector<32x96xf32>
    %c0_1 = arith.constant 0 : index
    %c0_2 = arith.constant 0 : index
    %1 = vector.load %arg4[%c0_1, %c0_2] : memref<9x128xf32, #tpu.memory_space<vmem>>, vector<1x96xf32>
    %c32 = arith.constant 32 : index
    %c0_3 = arith.constant 0 : index
    %2 = vector.load %arg3[%c32, %c0_3] : memref<1280x128xf32, #tpu.memory_space<vmem>>, vector<32x32xf32>
    %c1 = arith.constant 1 : index
    %c0_4 = arith.constant 0 : index
    %3 = vector.load %arg4[%c1, %c0_4] : memref<9x128xf32, #tpu.memory_space<vmem>>, vector<1x32xf32>
    %c64 = arith.constant 64 : index
    %c0_5 = arith.constant 0 : index
    %4 = vector.load %arg3[%c64, %c0_5] : memref<1280x128xf32, #tpu.memory_space<vmem>>, vector<32x32xf32>
    %c2 = arith.constant 2 : index
    %c0_6 = arith.constant 0 : index
    %5 = vector.load %arg4[%c2, %c0_6] : memref<9x128xf32, #tpu.memory_space<vmem>>, vector<1x32xf32>
    %c96 = arith.constant 96 : index
    %c0_7 = arith.constant 0 : index
    %6 = vector.load %arg3[%c96, %c0_7] : memref<1280x128xf32, #tpu.memory_space<vmem>>, vector<32x96xf32>
    %c3 = arith.constant 3 : index
    %c0_8 = arith.constant 0 : index
    %7 = vector.load %arg4[%c3, %c0_8] : memref<9x128xf32, #tpu.memory_space<vmem>>, vector<1x96xf32>
    %c128 = arith.constant 128 : index
    %c0_9 = arith.constant 0 : index
    %8 = vector.load %arg3[%c128, %c0_9] : memref<1280x128xf32, #tpu.memory_space<vmem>>, vector<32x32xf32>
    %c4 = arith.constant 4 : index
    %c0_10 = arith.constant 0 : index
    %9 = vector.load %arg4[%c4, %c0_10] : memref<9x128xf32, #tpu.memory_space<vmem>>, vector<1x32xf32>
    %c160 = arith.constant 160 : index
    %c0_11 = arith.constant 0 : index
    %10 = vector.load %arg3[%c160, %c0_11] : memref<1280x128xf32, #tpu.memory_space<vmem>>, vector<32x32xf32>
    %c5 = arith.constant 5 : index
    %c0_12 = arith.constant 0 : index
    %11 = vector.load %arg4[%c5, %c0_12] : memref<9x128xf32, #tpu.memory_space<vmem>>, vector<1x32xf32>
    %c192 = arith.constant 192 : index
    %c0_13 = arith.constant 0 : index
    %12 = vector.load %arg3[%c192, %c0_13] : memref<1280x128xf32, #tpu.memory_space<vmem>>, vector<768x32xf32>
    %c6 = arith.constant 6 : index
    %c0_14 = arith.constant 0 : index
    %13 = vector.load %arg4[%c6, %c0_14] : memref<9x128xf32, #tpu.memory_space<vmem>>, vector<1x32xf32>
    %c960 = arith.constant 960 : index
    %c0_15 = arith.constant 0 : index
    %14 = vector.load %arg3[%c960, %c0_15] : memref<1280x128xf32, #tpu.memory_space<vmem>>, vector<32x32xf32>
    %c7 = arith.constant 7 : index
    %c0_16 = arith.constant 0 : index
    %15 = vector.load %arg4[%c7, %c0_16] : memref<9x128xf32, #tpu.memory_space<vmem>>, vector<1x32xf32>
    %c1248 = arith.constant 1248 : index
    %c0_17 = arith.constant 0 : index
    %16 = vector.load %arg3[%c1248, %c0_17] : memref<1280x128xf32, #tpu.memory_space<vmem>>, vector<32x1xf32>
    %c8 = arith.constant 8 : index
    %c0_18 = arith.constant 0 : index
    %17 = vector.load %arg4[%c8, %c0_18] : memref<9x128xf32, #tpu.memory_space<vmem>>, vector<1x1xf32>
    %c0_19 = arith.constant 0 : index
    %c0_20 = arith.constant 0 : index
    %18 = vector.load %arg1[%c0_19, %c0_20] : memref<2x768xf32, #tpu.memory_space<vmem>>, vector<2x768xf32>
    %cst = arith.constant dense<0.000000e+00> : vector<2x32xf32>
    %19 = tpu.matmul %18, %12, %cst {dimension_numbers = #tpu.dot_dimension_numbers<[1], [0], [0], [1], [0, 0, 1, 1], [], []>} : vector<2x768xf32>, vector<768x32xf32>, vector<2x32xf32> -> vector<2x32xf32>
    %20 = vector.broadcast %13 : vector<1x32xf32> to vector<2x32xf32>
    %21 = arith.addf %19, %20 : vector<2x32xf32>
    %c0_21 = arith.constant 0 : index
    %c0_22 = arith.constant 0 : index
    %22 = memref.load %arg0[%c0_21, %c0_22] : memref<2x8xi32, #tpu.memory_space<smem>>
    %23 = arith.index_cast %22 : i32 to index
    %c0_23 = arith.constant 0 : index
    %24 = vector.load %arg2[%23, %c0_23] : memref<100x32xf32, #tpu.memory_space<vmem>>, vector<1x32xf32>
    %c0_24 = arith.constant 0 : index
    %c1_25 = arith.constant 1 : index
    %25 = memref.load %arg0[%c0_24, %c1_25] : memref<2x8xi32, #tpu.memory_space<smem>>
    %26 = arith.index_cast %25 : i32 to index
    %c0_26 = arith.constant 0 : index
    %27 = vector.load %arg2[%26, %c0_26] : memref<100x32xf32, #tpu.memory_space<vmem>>, vector<1x32xf32>
    %c0_27 = arith.constant 0 : index
    %c2_28 = arith.constant 2 : index
    %28 = memref.load %arg0[%c0_27, %c2_28] : memref<2x8xi32, #tpu.memory_space<smem>>
    %29 = arith.index_cast %28 : i32 to index
    %c0_29 = arith.constant 0 : index
    %30 = vector.load %arg2[%29, %c0_29] : memref<100x32xf32, #tpu.memory_space<vmem>>, vector<1x32xf32>
    %c0_30 = arith.constant 0 : index
    %c3_31 = arith.constant 3 : index
    %31 = memref.load %arg0[%c0_30, %c3_31] : memref<2x8xi32, #tpu.memory_space<smem>>
    %32 = arith.index_cast %31 : i32 to index
    %c0_32 = arith.constant 0 : index
    %33 = vector.load %arg2[%32, %c0_32] : memref<100x32xf32, #tpu.memory_space<vmem>>, vector<1x32xf32>
    %c0_33 = arith.constant 0 : index
    %c4_34 = arith.constant 4 : index
    %34 = memref.load %arg0[%c0_33, %c4_34] : memref<2x8xi32, #tpu.memory_space<smem>>
    %35 = arith.index_cast %34 : i32 to index
    %c0_35 = arith.constant 0 : index
    %36 = vector.load %arg2[%35, %c0_35] : memref<100x32xf32, #tpu.memory_space<vmem>>, vector<1x32xf32>
    %c0_36 = arith.constant 0 : index
    %c5_37 = arith.constant 5 : index
    %37 = memref.load %arg0[%c0_36, %c5_37] : memref<2x8xi32, #tpu.memory_space<smem>>
    %38 = arith.index_cast %37 : i32 to index
    %c0_38 = arith.constant 0 : index
    %39 = vector.load %arg2[%38, %c0_38] : memref<100x32xf32, #tpu.memory_space<vmem>>, vector<1x32xf32>
    %c0_39 = arith.constant 0 : index
    %c6_40 = arith.constant 6 : index
    %40 = memref.load %arg0[%c0_39, %c6_40] : memref<2x8xi32, #tpu.memory_space<smem>>
    %41 = arith.index_cast %40 : i32 to index
    %c0_41 = arith.constant 0 : index
    %42 = vector.load %arg2[%41, %c0_41] : memref<100x32xf32, #tpu.memory_space<vmem>>, vector<1x32xf32>
    %c0_42 = arith.constant 0 : index
    %c7_43 = arith.constant 7 : index
    %43 = memref.load %arg0[%c0_42, %c7_43] : memref<2x8xi32, #tpu.memory_space<smem>>
    %44 = arith.index_cast %43 : i32 to index
    %c0_44 = arith.constant 0 : index
    %45 = vector.load %arg2[%44, %c0_44] : memref<100x32xf32, #tpu.memory_space<vmem>>, vector<1x32xf32>
    %46 = tpu.concatenate %24, %27, %30, %33, %36, %39, %42, %45 in 0 : vector<1x32xf32>, vector<1x32xf32>, vector<1x32xf32>, vector<1x32xf32>, vector<1x32xf32>, vector<1x32xf32>, vector<1x32xf32>, vector<1x32xf32> -> vector<8x32xf32>
    %cst_45 = arith.constant dense<0.000000e+00> : vector<8x96xf32>
    %47 = tpu.matmul %46, %0, %cst_45 {dimension_numbers = #tpu.dot_dimension_numbers<[1], [0], [0], [1], [0, 0, 1, 1], [], []>} : vector<8x32xf32>, vector<32x96xf32>, vector<8x96xf32> -> vector<8x96xf32>
    %48 = vector.broadcast %1 : vector<1x96xf32> to vector<8x96xf32>
    %49 = arith.addf %47, %48 : vector<8x96xf32>
    %50 = vector.extract_strided_slice %49 {offsets = [0, 0], sizes = [8, 16], strides = [1, 1]} : vector<8x96xf32> to vector<8x16xf32>
    %cst_46 = arith.constant 2.500000e-01 : f32
    %51 = vector.broadcast %cst_46 : f32 to vector<8x16xf32>
    %52 = arith.mulf %50, %51 : vector<8x16xf32>
    %53 = vector.extract_strided_slice %49 {offsets = [0, 32], sizes = [8, 16], strides = [1, 1]} : vector<8x96xf32> to vector<8x16xf32>
    %54 = vector.extract_strided_slice %49 {offsets = [0, 64], sizes = [8, 16], strides = [1, 1]} : vector<8x96xf32> to vector<8x16xf32>
    %cst_47 = arith.constant dense<0.000000e+00> : vector<8x8xf32>
    %55 = tpu.matmul %52, %53, %cst_47 {dimension_numbers = #tpu.dot_dimension_numbers<[1], [1], [0], [0], [0, 0, 1, 0], [], []>} : vector<8x16xf32>, vector<8x16xf32>, vector<8x8xf32> -> vector<8x8xf32>
    %cst_48 = arith.constant dense<0xFF800000> : vector<8xf32>
    %56 = vector.multi_reduction <maximumf>, %55, %cst_48 [1] : vector<8x8xf32> to vector<8xf32>
    %57 = vector.shape_cast %56 : vector<8xf32> to vector<8x1xf32>
    %58 = vector.broadcast %57 : vector<8x1xf32> to vector<8x8xf32>
    %59 = arith.subf %55, %58 : vector<8x8xf32>
    %60 = math.exp %59 : vector<8x8xf32>
    %cst_49 = arith.constant dense<0.000000e+00> : vector<8xf32>
    %61 = vector.multi_reduction <add>, %60, %cst_49 [1] : vector<8x8xf32> to vector<8xf32>
    %62 = vector.shape_cast %61 : vector<8xf32> to vector<8x1xf32>
    %63 = tpu.reciprocal %62 {approx = true} : vector<8x1xf32> -> vector<8x1xf32>
    %64 = vector.broadcast %63 : vector<8x1xf32> to vector<8x8xf32>
    %65 = arith.mulf %60, %64 : vector<8x8xf32>
    %cst_50 = arith.constant dense<0.000000e+00> : vector<8x16xf32>
    %66 = tpu.matmul %65, %54, %cst_50 {dimension_numbers = #tpu.dot_dimension_numbers<[1], [0], [0], [1], [0, 0, 1, 1], [], []>} : vector<8x8xf32>, vector<8x16xf32>, vector<8x16xf32> -> vector<8x16xf32>
    %67 = vector.extract_strided_slice %2 {offsets = [0, 0], sizes = [16, 32], strides = [1, 1]} : vector<32x32xf32> to vector<16x32xf32>
    %cst_51 = arith.constant dense<0.000000e+00> : vector<8x32xf32>
    %68 = tpu.matmul %66, %67, %cst_51 {dimension_numbers = #tpu.dot_dimension_numbers<[1], [0], [0], [1], [0, 0, 1, 1], [], []>} : vector<8x16xf32>, vector<16x32xf32>, vector<8x32xf32> -> vector<8x32xf32>
    %69 = vector.extract_strided_slice %49 {offsets = [0, 16], sizes = [8, 16], strides = [1, 1]} : vector<8x96xf32> to vector<8x16xf32>
    %cst_52 = arith.constant 2.500000e-01 : f32
    %70 = vector.broadcast %cst_52 : f32 to vector<8x16xf32>
    %71 = arith.mulf %69, %70 : vector<8x16xf32>
    %72 = vector.extract_strided_slice %49 {offsets = [0, 48], sizes = [8, 16], strides = [1, 1]} : vector<8x96xf32> to vector<8x16xf32>
    %73 = vector.extract_strided_slice %49 {offsets = [0, 80], sizes = [8, 16], strides = [1, 1]} : vector<8x96xf32> to vector<8x16xf32>
    %cst_53 = arith.constant dense<0.000000e+00> : vector<8x8xf32>
    %74 = tpu.matmul %71, %72, %cst_53 {dimension_numbers = #tpu.dot_dimension_numbers<[1], [1], [0], [0], [0, 0, 1, 0], [], []>} : vector<8x16xf32>, vector<8x16xf32>, vector<8x8xf32> -> vector<8x8xf32>
    %cst_54 = arith.constant dense<0xFF800000> : vector<8xf32>
    %75 = vector.multi_reduction <maximumf>, %74, %cst_54 [1] : vector<8x8xf32> to vector<8xf32>
    %76 = vector.shape_cast %75 : vector<8xf32> to vector<8x1xf32>
    %77 = vector.broadcast %76 : vector<8x1xf32> to vector<8x8xf32>
    %78 = arith.subf %74, %77 : vector<8x8xf32>
    %79 = math.exp %78 : vector<8x8xf32>
    %cst_55 = arith.constant dense<0.000000e+00> : vector<8xf32>
    %80 = vector.multi_reduction <add>, %79, %cst_55 [1] : vector<8x8xf32> to vector<8xf32>
    %81 = vector.shape_cast %80 : vector<8xf32> to vector<8x1xf32>
    %82 = tpu.reciprocal %81 {approx = true} : vector<8x1xf32> -> vector<8x1xf32>
    %83 = vector.broadcast %82 : vector<8x1xf32> to vector<8x8xf32>
    %84 = arith.mulf %79, %83 : vector<8x8xf32>
    %cst_56 = arith.constant dense<0.000000e+00> : vector<8x16xf32>
    %85 = tpu.matmul %84, %73, %cst_56 {dimension_numbers = #tpu.dot_dimension_numbers<[1], [0], [0], [1], [0, 0, 1, 1], [], []>} : vector<8x8xf32>, vector<8x16xf32>, vector<8x16xf32> -> vector<8x16xf32>
    %86 = vector.extract_strided_slice %2 {offsets = [16, 0], sizes = [16, 32], strides = [1, 1]} : vector<32x32xf32> to vector<16x32xf32>
    %cst_57 = arith.constant dense<0.000000e+00> : vector<8x32xf32>
    %87 = tpu.matmul %85, %86, %cst_57 {dimension_numbers = #tpu.dot_dimension_numbers<[1], [0], [0], [1], [0, 0, 1, 1], [], []>} : vector<8x16xf32>, vector<16x32xf32>, vector<8x32xf32> -> vector<8x32xf32>
    %88 = arith.addf %68, %87 : vector<8x32xf32>
    %89 = vector.broadcast %3 : vector<1x32xf32> to vector<8x32xf32>
    %90 = arith.addf %88, %89 : vector<8x32xf32>
    %cst_58 = arith.constant 0.000000e+00 : f32
    %91 = vector.broadcast %cst_58 : f32 to vector<8x32xf32>
    %92 = arith.maximumf %90, %91 : vector<8x32xf32>
    %cst_59 = arith.constant dense<0.000000e+00> : vector<8x32xf32>
    %93 = tpu.matmul %92, %4, %cst_59 {dimension_numbers = #tpu.dot_dimension_numbers<[1], [0], [0], [1], [0, 0, 1, 1], [], []>} : vector<8x32xf32>, vector<32x32xf32>, vector<8x32xf32> -> vector<8x32xf32>
    %94 = vector.broadcast %5 : vector<1x32xf32> to vector<8x32xf32>
    %95 = arith.addf %93, %94 : vector<8x32xf32>
    %cst_60 = arith.constant 0.000000e+00 : f32
    %96 = vector.broadcast %cst_60 : f32 to vector<8x32xf32>
    %97 = arith.maximumf %95, %96 : vector<8x32xf32>
    %cst_61 = arith.constant dense<0.000000e+00> : vector<8x96xf32>
    %98 = tpu.matmul %97, %6, %cst_61 {dimension_numbers = #tpu.dot_dimension_numbers<[1], [0], [0], [1], [0, 0, 1, 1], [], []>} : vector<8x32xf32>, vector<32x96xf32>, vector<8x96xf32> -> vector<8x96xf32>
    %99 = vector.broadcast %7 : vector<1x96xf32> to vector<8x96xf32>
    %100 = arith.addf %98, %99 : vector<8x96xf32>
    %101 = vector.extract_strided_slice %100 {offsets = [0, 0], sizes = [8, 16], strides = [1, 1]} : vector<8x96xf32> to vector<8x16xf32>
    %cst_62 = arith.constant 2.500000e-01 : f32
    %102 = vector.broadcast %cst_62 : f32 to vector<8x16xf32>
    %103 = arith.mulf %101, %102 : vector<8x16xf32>
    %104 = vector.extract_strided_slice %100 {offsets = [0, 32], sizes = [8, 16], strides = [1, 1]} : vector<8x96xf32> to vector<8x16xf32>
    %105 = vector.extract_strided_slice %100 {offsets = [0, 64], sizes = [8, 16], strides = [1, 1]} : vector<8x96xf32> to vector<8x16xf32>
    %cst_63 = arith.constant dense<0.000000e+00> : vector<8x8xf32>
    %106 = tpu.matmul %103, %104, %cst_63 {dimension_numbers = #tpu.dot_dimension_numbers<[1], [1], [0], [0], [0, 0, 1, 0], [], []>} : vector<8x16xf32>, vector<8x16xf32>, vector<8x8xf32> -> vector<8x8xf32>
    %cst_64 = arith.constant dense<0xFF800000> : vector<8xf32>
    %107 = vector.multi_reduction <maximumf>, %106, %cst_64 [1] : vector<8x8xf32> to vector<8xf32>
    %108 = vector.shape_cast %107 : vector<8xf32> to vector<8x1xf32>
    %109 = vector.broadcast %108 : vector<8x1xf32> to vector<8x8xf32>
    %110 = arith.subf %106, %109 : vector<8x8xf32>
    %111 = math.exp %110 : vector<8x8xf32>
    %cst_65 = arith.constant dense<0.000000e+00> : vector<8xf32>
    %112 = vector.multi_reduction <add>, %111, %cst_65 [1] : vector<8x8xf32> to vector<8xf32>
    %113 = vector.shape_cast %112 : vector<8xf32> to vector<8x1xf32>
    %114 = tpu.reciprocal %113 {approx = true} : vector<8x1xf32> -> vector<8x1xf32>
    %115 = vector.broadcast %114 : vector<8x1xf32> to vector<8x8xf32>
    %116 = arith.mulf %111, %115 : vector<8x8xf32>
    %cst_66 = arith.constant dense<0.000000e+00> : vector<8x16xf32>
    %117 = tpu.matmul %116, %105, %cst_66 {dimension_numbers = #tpu.dot_dimension_numbers<[1], [0], [0], [1], [0, 0, 1, 1], [], []>} : vector<8x8xf32>, vector<8x16xf32>, vector<8x16xf32> -> vector<8x16xf32>
    %118 = vector.extract_strided_slice %8 {offsets = [0, 0], sizes = [16, 32], strides = [1, 1]} : vector<32x32xf32> to vector<16x32xf32>
    %cst_67 = arith.constant dense<0.000000e+00> : vector<8x32xf32>
    %119 = tpu.matmul %117, %118, %cst_67 {dimension_numbers = #tpu.dot_dimension_numbers<[1], [0], [0], [1], [0, 0, 1, 1], [], []>} : vector<8x16xf32>, vector<16x32xf32>, vector<8x32xf32> -> vector<8x32xf32>
    %120 = vector.extract_strided_slice %100 {offsets = [0, 16], sizes = [8, 16], strides = [1, 1]} : vector<8x96xf32> to vector<8x16xf32>
    %cst_68 = arith.constant 2.500000e-01 : f32
    %121 = vector.broadcast %cst_68 : f32 to vector<8x16xf32>
    %122 = arith.mulf %120, %121 : vector<8x16xf32>
    %123 = vector.extract_strided_slice %100 {offsets = [0, 48], sizes = [8, 16], strides = [1, 1]} : vector<8x96xf32> to vector<8x16xf32>
    %124 = vector.extract_strided_slice %100 {offsets = [0, 80], sizes = [8, 16], strides = [1, 1]} : vector<8x96xf32> to vector<8x16xf32>
    %cst_69 = arith.constant dense<0.000000e+00> : vector<8x8xf32>
    %125 = tpu.matmul %122, %123, %cst_69 {dimension_numbers = #tpu.dot_dimension_numbers<[1], [1], [0], [0], [0, 0, 1, 0], [], []>} : vector<8x16xf32>, vector<8x16xf32>, vector<8x8xf32> -> vector<8x8xf32>
    %cst_70 = arith.constant dense<0xFF800000> : vector<8xf32>
    %126 = vector.multi_reduction <maximumf>, %125, %cst_70 [1] : vector<8x8xf32> to vector<8xf32>
    %127 = vector.shape_cast %126 : vector<8xf32> to vector<8x1xf32>
    %128 = vector.broadcast %127 : vector<8x1xf32> to vector<8x8xf32>
    %129 = arith.subf %125, %128 : vector<8x8xf32>
    %130 = math.exp %129 : vector<8x8xf32>
    %cst_71 = arith.constant dense<0.000000e+00> : vector<8xf32>
    %131 = vector.multi_reduction <add>, %130, %cst_71 [1] : vector<8x8xf32> to vector<8xf32>
    %132 = vector.shape_cast %131 : vector<8xf32> to vector<8x1xf32>
    %133 = tpu.reciprocal %132 {approx = true} : vector<8x1xf32> -> vector<8x1xf32>
    %134 = vector.broadcast %133 : vector<8x1xf32> to vector<8x8xf32>
    %135 = arith.mulf %130, %134 : vector<8x8xf32>
    %cst_72 = arith.constant dense<0.000000e+00> : vector<8x16xf32>
    %136 = tpu.matmul %135, %124, %cst_72 {dimension_numbers = #tpu.dot_dimension_numbers<[1], [0], [0], [1], [0, 0, 1, 1], [], []>} : vector<8x8xf32>, vector<8x16xf32>, vector<8x16xf32> -> vector<8x16xf32>
    %137 = vector.extract_strided_slice %8 {offsets = [16, 0], sizes = [16, 32], strides = [1, 1]} : vector<32x32xf32> to vector<16x32xf32>
    %cst_73 = arith.constant dense<0.000000e+00> : vector<8x32xf32>
    %138 = tpu.matmul %136, %137, %cst_73 {dimension_numbers = #tpu.dot_dimension_numbers<[1], [0], [0], [1], [0, 0, 1, 1], [], []>} : vector<8x16xf32>, vector<16x32xf32>, vector<8x32xf32> -> vector<8x32xf32>
    %139 = arith.addf %119, %138 : vector<8x32xf32>
    %140 = vector.broadcast %9 : vector<1x32xf32> to vector<8x32xf32>
    %141 = arith.addf %139, %140 : vector<8x32xf32>
    %cst_74 = arith.constant 0.000000e+00 : f32
    %142 = vector.broadcast %cst_74 : f32 to vector<8x32xf32>
    %143 = arith.maximumf %141, %142 : vector<8x32xf32>
    %cst_75 = arith.constant dense<0.000000e+00> : vector<8x32xf32>
    %144 = tpu.matmul %143, %10, %cst_75 {dimension_numbers = #tpu.dot_dimension_numbers<[1], [0], [0], [1], [0, 0, 1, 1], [], []>} : vector<8x32xf32>, vector<32x32xf32>, vector<8x32xf32> -> vector<8x32xf32>
    %145 = vector.broadcast %11 : vector<1x32xf32> to vector<8x32xf32>
    %146 = arith.addf %144, %145 : vector<8x32xf32>
    %147 = vector.extract_strided_slice %21 {offsets = [0, 0], sizes = [1, 32], strides = [1, 1]} : vector<2x32xf32> to vector<1x32xf32>
    %cst_76 = arith.constant dense<0.000000e+00> : vector<1x32xf32>
    %148 = tpu.matmul %147, %14, %cst_76 {dimension_numbers = #tpu.dot_dimension_numbers<[1], [0], [0], [1], [0, 0, 1, 1], [], []>} : vector<1x32xf32>, vector<32x32xf32>, vector<1x32xf32> -> vector<1x32xf32>
    %c992 = arith.constant 992 : index
    %c0_77 = arith.constant 0 : index
    %149 = vector.load %arg3[%c992, %c0_77] : memref<1280x128xf32, #tpu.memory_space<vmem>>, vector<32x32xf32>
    %150 = vector.extract_strided_slice %146 {offsets = [0, 0], sizes = [1, 32], strides = [1, 1]} : vector<8x32xf32> to vector<1x32xf32>
    %cst_78 = arith.constant dense<0.000000e+00> : vector<1x32xf32>
    %151 = tpu.matmul %150, %149, %cst_78 {dimension_numbers = #tpu.dot_dimension_numbers<[1], [0], [0], [1], [0, 0, 1, 1], [], []>} : vector<1x32xf32>, vector<32x32xf32>, vector<1x32xf32> -> vector<1x32xf32>
    %152 = arith.addf %148, %151 : vector<1x32xf32>
    %c1024 = arith.constant 1024 : index
    %c0_79 = arith.constant 0 : index
    %153 = vector.load %arg3[%c1024, %c0_79] : memref<1280x128xf32, #tpu.memory_space<vmem>>, vector<32x32xf32>
    %154 = vector.extract_strided_slice %146 {offsets = [1, 0], sizes = [1, 32], strides = [1, 1]} : vector<8x32xf32> to vector<1x32xf32>
    %cst_80 = arith.constant dense<0.000000e+00> : vector<1x32xf32>
    %155 = tpu.matmul %154, %153, %cst_80 {dimension_numbers = #tpu.dot_dimension_numbers<[1], [0], [0], [1], [0, 0, 1, 1], [], []>} : vector<1x32xf32>, vector<32x32xf32>, vector<1x32xf32> -> vector<1x32xf32>
    %156 = arith.addf %152, %155 : vector<1x32xf32>
    %c1056 = arith.constant 1056 : index
    %c0_81 = arith.constant 0 : index
    %157 = vector.load %arg3[%c1056, %c0_81] : memref<1280x128xf32, #tpu.memory_space<vmem>>, vector<32x32xf32>
    %158 = vector.extract_strided_slice %146 {offsets = [2, 0], sizes = [1, 32], strides = [1, 1]} : vector<8x32xf32> to vector<1x32xf32>
    %cst_82 = arith.constant dense<0.000000e+00> : vector<1x32xf32>
    %159 = tpu.matmul %158, %157, %cst_82 {dimension_numbers = #tpu.dot_dimension_numbers<[1], [0], [0], [1], [0, 0, 1, 1], [], []>} : vector<1x32xf32>, vector<32x32xf32>, vector<1x32xf32> -> vector<1x32xf32>
    %160 = arith.addf %156, %159 : vector<1x32xf32>
    %c1088 = arith.constant 1088 : index
    %c0_83 = arith.constant 0 : index
    %161 = vector.load %arg3[%c1088, %c0_83] : memref<1280x128xf32, #tpu.memory_space<vmem>>, vector<32x32xf32>
    %162 = vector.extract_strided_slice %146 {offsets = [3, 0], sizes = [1, 32], strides = [1, 1]} : vector<8x32xf32> to vector<1x32xf32>
    %cst_84 = arith.constant dense<0.000000e+00> : vector<1x32xf32>
    %163 = tpu.matmul %162, %161, %cst_84 {dimension_numbers = #tpu.dot_dimension_numbers<[1], [0], [0], [1], [0, 0, 1, 1], [], []>} : vector<1x32xf32>, vector<32x32xf32>, vector<1x32xf32> -> vector<1x32xf32>
    %164 = arith.addf %160, %163 : vector<1x32xf32>
    %c1120 = arith.constant 1120 : index
    %c0_85 = arith.constant 0 : index
    %165 = vector.load %arg3[%c1120, %c0_85] : memref<1280x128xf32, #tpu.memory_space<vmem>>, vector<32x32xf32>
    %166 = vector.extract_strided_slice %146 {offsets = [4, 0], sizes = [1, 32], strides = [1, 1]} : vector<8x32xf32> to vector<1x32xf32>
    %cst_86 = arith.constant dense<0.000000e+00> : vector<1x32xf32>
    %167 = tpu.matmul %166, %165, %cst_86 {dimension_numbers = #tpu.dot_dimension_numbers<[1], [0], [0], [1], [0, 0, 1, 1], [], []>} : vector<1x32xf32>, vector<32x32xf32>, vector<1x32xf32> -> vector<1x32xf32>
    %168 = arith.addf %164, %167 : vector<1x32xf32>
    %c1152 = arith.constant 1152 : index
    %c0_87 = arith.constant 0 : index
    %169 = vector.load %arg3[%c1152, %c0_87] : memref<1280x128xf32, #tpu.memory_space<vmem>>, vector<32x32xf32>
    %170 = vector.extract_strided_slice %146 {offsets = [5, 0], sizes = [1, 32], strides = [1, 1]} : vector<8x32xf32> to vector<1x32xf32>
    %cst_88 = arith.constant dense<0.000000e+00> : vector<1x32xf32>
    %171 = tpu.matmul %170, %169, %cst_88 {dimension_numbers = #tpu.dot_dimension_numbers<[1], [0], [0], [1], [0, 0, 1, 1], [], []>} : vector<1x32xf32>, vector<32x32xf32>, vector<1x32xf32> -> vector<1x32xf32>
    %172 = arith.addf %168, %171 : vector<1x32xf32>
    %c1184 = arith.constant 1184 : index
    %c0_89 = arith.constant 0 : index
    %173 = vector.load %arg3[%c1184, %c0_89] : memref<1280x128xf32, #tpu.memory_space<vmem>>, vector<32x32xf32>
    %174 = vector.extract_strided_slice %146 {offsets = [6, 0], sizes = [1, 32], strides = [1, 1]} : vector<8x32xf32> to vector<1x32xf32>
    %cst_90 = arith.constant dense<0.000000e+00> : vector<1x32xf32>
    %175 = tpu.matmul %174, %173, %cst_90 {dimension_numbers = #tpu.dot_dimension_numbers<[1], [0], [0], [1], [0, 0, 1, 1], [], []>} : vector<1x32xf32>, vector<32x32xf32>, vector<1x32xf32> -> vector<1x32xf32>
    %176 = arith.addf %172, %175 : vector<1x32xf32>
    %c1216 = arith.constant 1216 : index
    %c0_91 = arith.constant 0 : index
    %177 = vector.load %arg3[%c1216, %c0_91] : memref<1280x128xf32, #tpu.memory_space<vmem>>, vector<32x32xf32>
    %178 = vector.extract_strided_slice %146 {offsets = [7, 0], sizes = [1, 32], strides = [1, 1]} : vector<8x32xf32> to vector<1x32xf32>
    %cst_92 = arith.constant dense<0.000000e+00> : vector<1x32xf32>
    %179 = tpu.matmul %178, %177, %cst_92 {dimension_numbers = #tpu.dot_dimension_numbers<[1], [0], [0], [1], [0, 0, 1, 1], [], []>} : vector<1x32xf32>, vector<32x32xf32>, vector<1x32xf32> -> vector<1x32xf32>
    %180 = arith.addf %176, %179 : vector<1x32xf32>
    %c1_93 = arith.constant 1 : index
    %c0_94 = arith.constant 0 : index
    %181 = memref.load %arg0[%c1_93, %c0_94] : memref<2x8xi32, #tpu.memory_space<smem>>
    %182 = arith.index_cast %181 : i32 to index
    %c0_95 = arith.constant 0 : index
    %183 = vector.load %arg2[%182, %c0_95] : memref<100x32xf32, #tpu.memory_space<vmem>>, vector<1x32xf32>
    %c1_96 = arith.constant 1 : index
    %c1_97 = arith.constant 1 : index
    %184 = memref.load %arg0[%c1_96, %c1_97] : memref<2x8xi32, #tpu.memory_space<smem>>
    %185 = arith.index_cast %184 : i32 to index
    %c0_98 = arith.constant 0 : index
    %186 = vector.load %arg2[%185, %c0_98] : memref<100x32xf32, #tpu.memory_space<vmem>>, vector<1x32xf32>
    %c1_99 = arith.constant 1 : index
    %c2_100 = arith.constant 2 : index
    %187 = memref.load %arg0[%c1_99, %c2_100] : memref<2x8xi32, #tpu.memory_space<smem>>
    %188 = arith.index_cast %187 : i32 to index
    %c0_101 = arith.constant 0 : index
    %189 = vector.load %arg2[%188, %c0_101] : memref<100x32xf32, #tpu.memory_space<vmem>>, vector<1x32xf32>
    %c1_102 = arith.constant 1 : index
    %c3_103 = arith.constant 3 : index
    %190 = memref.load %arg0[%c1_102, %c3_103] : memref<2x8xi32, #tpu.memory_space<smem>>
    %191 = arith.index_cast %190 : i32 to index
    %c0_104 = arith.constant 0 : index
    %192 = vector.load %arg2[%191, %c0_104] : memref<100x32xf32, #tpu.memory_space<vmem>>, vector<1x32xf32>
    %c1_105 = arith.constant 1 : index
    %c4_106 = arith.constant 4 : index
    %193 = memref.load %arg0[%c1_105, %c4_106] : memref<2x8xi32, #tpu.memory_space<smem>>
    %194 = arith.index_cast %193 : i32 to index
    %c0_107 = arith.constant 0 : index
    %195 = vector.load %arg2[%194, %c0_107] : memref<100x32xf32, #tpu.memory_space<vmem>>, vector<1x32xf32>
    %c1_108 = arith.constant 1 : index
    %c5_109 = arith.constant 5 : index
    %196 = memref.load %arg0[%c1_108, %c5_109] : memref<2x8xi32, #tpu.memory_space<smem>>
    %197 = arith.index_cast %196 : i32 to index
    %c0_110 = arith.constant 0 : index
    %198 = vector.load %arg2[%197, %c0_110] : memref<100x32xf32, #tpu.memory_space<vmem>>, vector<1x32xf32>
    %c1_111 = arith.constant 1 : index
    %c6_112 = arith.constant 6 : index
    %199 = memref.load %arg0[%c1_111, %c6_112] : memref<2x8xi32, #tpu.memory_space<smem>>
    %200 = arith.index_cast %199 : i32 to index
    %c0_113 = arith.constant 0 : index
    %201 = vector.load %arg2[%200, %c0_113] : memref<100x32xf32, #tpu.memory_space<vmem>>, vector<1x32xf32>
    %c1_114 = arith.constant 1 : index
    %c7_115 = arith.constant 7 : index
    %202 = memref.load %arg0[%c1_114, %c7_115] : memref<2x8xi32, #tpu.memory_space<smem>>
    %203 = arith.index_cast %202 : i32 to index
    %c0_116 = arith.constant 0 : index
    %204 = vector.load %arg2[%203, %c0_116] : memref<100x32xf32, #tpu.memory_space<vmem>>, vector<1x32xf32>
    %205 = tpu.concatenate %183, %186, %189, %192, %195, %198, %201, %204 in 0 : vector<1x32xf32>, vector<1x32xf32>, vector<1x32xf32>, vector<1x32xf32>, vector<1x32xf32>, vector<1x32xf32>, vector<1x32xf32>, vector<1x32xf32> -> vector<8x32xf32>
    %cst_117 = arith.constant dense<0.000000e+00> : vector<8x96xf32>
    %206 = tpu.matmul %205, %0, %cst_117 {dimension_numbers = #tpu.dot_dimension_numbers<[1], [0], [0], [1], [0, 0, 1, 1], [], []>} : vector<8x32xf32>, vector<32x96xf32>, vector<8x96xf32> -> vector<8x96xf32>
    %207 = vector.broadcast %1 : vector<1x96xf32> to vector<8x96xf32>
    %208 = arith.addf %206, %207 : vector<8x96xf32>
    %209 = vector.extract_strided_slice %208 {offsets = [0, 0], sizes = [8, 16], strides = [1, 1]} : vector<8x96xf32> to vector<8x16xf32>
    %cst_118 = arith.constant 2.500000e-01 : f32
    %210 = vector.broadcast %cst_118 : f32 to vector<8x16xf32>
    %211 = arith.mulf %209, %210 : vector<8x16xf32>
    %212 = vector.extract_strided_slice %208 {offsets = [0, 32], sizes = [8, 16], strides = [1, 1]} : vector<8x96xf32> to vector<8x16xf32>
    %213 = vector.extract_strided_slice %208 {offsets = [0, 64], sizes = [8, 16], strides = [1, 1]} : vector<8x96xf32> to vector<8x16xf32>
    %cst_119 = arith.constant dense<0.000000e+00> : vector<8x8xf32>
    %214 = tpu.matmul %211, %212, %cst_119 {dimension_numbers = #tpu.dot_dimension_numbers<[1], [1], [0], [0], [0, 0, 1, 0], [], []>} : vector<8x16xf32>, vector<8x16xf32>, vector<8x8xf32> -> vector<8x8xf32>
    %cst_120 = arith.constant dense<0xFF800000> : vector<8xf32>
    %215 = vector.multi_reduction <maximumf>, %214, %cst_120 [1] : vector<8x8xf32> to vector<8xf32>
    %216 = vector.shape_cast %215 : vector<8xf32> to vector<8x1xf32>
    %217 = vector.broadcast %216 : vector<8x1xf32> to vector<8x8xf32>
    %218 = arith.subf %214, %217 : vector<8x8xf32>
    %219 = math.exp %218 : vector<8x8xf32>
    %cst_121 = arith.constant dense<0.000000e+00> : vector<8xf32>
    %220 = vector.multi_reduction <add>, %219, %cst_121 [1] : vector<8x8xf32> to vector<8xf32>
    %221 = vector.shape_cast %220 : vector<8xf32> to vector<8x1xf32>
    %222 = tpu.reciprocal %221 {approx = true} : vector<8x1xf32> -> vector<8x1xf32>
    %223 = vector.broadcast %222 : vector<8x1xf32> to vector<8x8xf32>
    %224 = arith.mulf %219, %223 : vector<8x8xf32>
    %cst_122 = arith.constant dense<0.000000e+00> : vector<8x16xf32>
    %225 = tpu.matmul %224, %213, %cst_122 {dimension_numbers = #tpu.dot_dimension_numbers<[1], [0], [0], [1], [0, 0, 1, 1], [], []>} : vector<8x8xf32>, vector<8x16xf32>, vector<8x16xf32> -> vector<8x16xf32>
    %226 = vector.extract_strided_slice %2 {offsets = [0, 0], sizes = [16, 32], strides = [1, 1]} : vector<32x32xf32> to vector<16x32xf32>
    %cst_123 = arith.constant dense<0.000000e+00> : vector<8x32xf32>
    %227 = tpu.matmul %225, %226, %cst_123 {dimension_numbers = #tpu.dot_dimension_numbers<[1], [0], [0], [1], [0, 0, 1, 1], [], []>} : vector<8x16xf32>, vector<16x32xf32>, vector<8x32xf32> -> vector<8x32xf32>
    %228 = vector.extract_strided_slice %208 {offsets = [0, 16], sizes = [8, 16], strides = [1, 1]} : vector<8x96xf32> to vector<8x16xf32>
    %cst_124 = arith.constant 2.500000e-01 : f32
    %229 = vector.broadcast %cst_124 : f32 to vector<8x16xf32>
    %230 = arith.mulf %228, %229 : vector<8x16xf32>
    %231 = vector.extract_strided_slice %208 {offsets = [0, 48], sizes = [8, 16], strides = [1, 1]} : vector<8x96xf32> to vector<8x16xf32>
    %232 = vector.extract_strided_slice %208 {offsets = [0, 80], sizes = [8, 16], strides = [1, 1]} : vector<8x96xf32> to vector<8x16xf32>
    %cst_125 = arith.constant dense<0.000000e+00> : vector<8x8xf32>
    %233 = tpu.matmul %230, %231, %cst_125 {dimension_numbers = #tpu.dot_dimension_numbers<[1], [1], [0], [0], [0, 0, 1, 0], [], []>} : vector<8x16xf32>, vector<8x16xf32>, vector<8x8xf32> -> vector<8x8xf32>
    %cst_126 = arith.constant dense<0xFF800000> : vector<8xf32>
    %234 = vector.multi_reduction <maximumf>, %233, %cst_126 [1] : vector<8x8xf32> to vector<8xf32>
    %235 = vector.shape_cast %234 : vector<8xf32> to vector<8x1xf32>
    %236 = vector.broadcast %235 : vector<8x1xf32> to vector<8x8xf32>
    %237 = arith.subf %233, %236 : vector<8x8xf32>
    %238 = math.exp %237 : vector<8x8xf32>
    %cst_127 = arith.constant dense<0.000000e+00> : vector<8xf32>
    %239 = vector.multi_reduction <add>, %238, %cst_127 [1] : vector<8x8xf32> to vector<8xf32>
    %240 = vector.shape_cast %239 : vector<8xf32> to vector<8x1xf32>
    %241 = tpu.reciprocal %240 {approx = true} : vector<8x1xf32> -> vector<8x1xf32>
    %242 = vector.broadcast %241 : vector<8x1xf32> to vector<8x8xf32>
    %243 = arith.mulf %238, %242 : vector<8x8xf32>
    %cst_128 = arith.constant dense<0.000000e+00> : vector<8x16xf32>
    %244 = tpu.matmul %243, %232, %cst_128 {dimension_numbers = #tpu.dot_dimension_numbers<[1], [0], [0], [1], [0, 0, 1, 1], [], []>} : vector<8x8xf32>, vector<8x16xf32>, vector<8x16xf32> -> vector<8x16xf32>
    %245 = vector.extract_strided_slice %2 {offsets = [16, 0], sizes = [16, 32], strides = [1, 1]} : vector<32x32xf32> to vector<16x32xf32>
    %cst_129 = arith.constant dense<0.000000e+00> : vector<8x32xf32>
    %246 = tpu.matmul %244, %245, %cst_129 {dimension_numbers = #tpu.dot_dimension_numbers<[1], [0], [0], [1], [0, 0, 1, 1], [], []>} : vector<8x16xf32>, vector<16x32xf32>, vector<8x32xf32> -> vector<8x32xf32>
    %247 = arith.addf %227, %246 : vector<8x32xf32>
    %248 = vector.broadcast %3 : vector<1x32xf32> to vector<8x32xf32>
    %249 = arith.addf %247, %248 : vector<8x32xf32>
    %cst_130 = arith.constant 0.000000e+00 : f32
    %250 = vector.broadcast %cst_130 : f32 to vector<8x32xf32>
    %251 = arith.maximumf %249, %250 : vector<8x32xf32>
    %cst_131 = arith.constant dense<0.000000e+00> : vector<8x32xf32>
    %252 = tpu.matmul %251, %4, %cst_131 {dimension_numbers = #tpu.dot_dimension_numbers<[1], [0], [0], [1], [0, 0, 1, 1], [], []>} : vector<8x32xf32>, vector<32x32xf32>, vector<8x32xf32> -> vector<8x32xf32>
    %253 = vector.broadcast %5 : vector<1x32xf32> to vector<8x32xf32>
    %254 = arith.addf %252, %253 : vector<8x32xf32>
    %cst_132 = arith.constant 0.000000e+00 : f32
    %255 = vector.broadcast %cst_132 : f32 to vector<8x32xf32>
    %256 = arith.maximumf %254, %255 : vector<8x32xf32>
    %cst_133 = arith.constant dense<0.000000e+00> : vector<8x96xf32>
    %257 = tpu.matmul %256, %6, %cst_133 {dimension_numbers = #tpu.dot_dimension_numbers<[1], [0], [0], [1], [0, 0, 1, 1], [], []>} : vector<8x32xf32>, vector<32x96xf32>, vector<8x96xf32> -> vector<8x96xf32>
    %258 = vector.broadcast %7 : vector<1x96xf32> to vector<8x96xf32>
    %259 = arith.addf %257, %258 : vector<8x96xf32>
    %260 = vector.extract_strided_slice %259 {offsets = [0, 0], sizes = [8, 16], strides = [1, 1]} : vector<8x96xf32> to vector<8x16xf32>
    %cst_134 = arith.constant 2.500000e-01 : f32
    %261 = vector.broadcast %cst_134 : f32 to vector<8x16xf32>
    %262 = arith.mulf %260, %261 : vector<8x16xf32>
    %263 = vector.extract_strided_slice %259 {offsets = [0, 32], sizes = [8, 16], strides = [1, 1]} : vector<8x96xf32> to vector<8x16xf32>
    %264 = vector.extract_strided_slice %259 {offsets = [0, 64], sizes = [8, 16], strides = [1, 1]} : vector<8x96xf32> to vector<8x16xf32>
    %cst_135 = arith.constant dense<0.000000e+00> : vector<8x8xf32>
    %265 = tpu.matmul %262, %263, %cst_135 {dimension_numbers = #tpu.dot_dimension_numbers<[1], [1], [0], [0], [0, 0, 1, 0], [], []>} : vector<8x16xf32>, vector<8x16xf32>, vector<8x8xf32> -> vector<8x8xf32>
    %cst_136 = arith.constant dense<0xFF800000> : vector<8xf32>
    %266 = vector.multi_reduction <maximumf>, %265, %cst_136 [1] : vector<8x8xf32> to vector<8xf32>
    %267 = vector.shape_cast %266 : vector<8xf32> to vector<8x1xf32>
    %268 = vector.broadcast %267 : vector<8x1xf32> to vector<8x8xf32>
    %269 = arith.subf %265, %268 : vector<8x8xf32>
    %270 = math.exp %269 : vector<8x8xf32>
    %cst_137 = arith.constant dense<0.000000e+00> : vector<8xf32>
    %271 = vector.multi_reduction <add>, %270, %cst_137 [1] : vector<8x8xf32> to vector<8xf32>
    %272 = vector.shape_cast %271 : vector<8xf32> to vector<8x1xf32>
    %273 = tpu.reciprocal %272 {approx = true} : vector<8x1xf32> -> vector<8x1xf32>
    %274 = vector.broadcast %273 : vector<8x1xf32> to vector<8x8xf32>
    %275 = arith.mulf %270, %274 : vector<8x8xf32>
    %cst_138 = arith.constant dense<0.000000e+00> : vector<8x16xf32>
    %276 = tpu.matmul %275, %264, %cst_138 {dimension_numbers = #tpu.dot_dimension_numbers<[1], [0], [0], [1], [0, 0, 1, 1], [], []>} : vector<8x8xf32>, vector<8x16xf32>, vector<8x16xf32> -> vector<8x16xf32>
    %277 = vector.extract_strided_slice %8 {offsets = [0, 0], sizes = [16, 32], strides = [1, 1]} : vector<32x32xf32> to vector<16x32xf32>
    %cst_139 = arith.constant dense<0.000000e+00> : vector<8x32xf32>
    %278 = tpu.matmul %276, %277, %cst_139 {dimension_numbers = #tpu.dot_dimension_numbers<[1], [0], [0], [1], [0, 0, 1, 1], [], []>} : vector<8x16xf32>, vector<16x32xf32>, vector<8x32xf32> -> vector<8x32xf32>
    %279 = vector.extract_strided_slice %259 {offsets = [0, 16], sizes = [8, 16], strides = [1, 1]} : vector<8x96xf32> to vector<8x16xf32>
    %cst_140 = arith.constant 2.500000e-01 : f32
    %280 = vector.broadcast %cst_140 : f32 to vector<8x16xf32>
    %281 = arith.mulf %279, %280 : vector<8x16xf32>
    %282 = vector.extract_strided_slice %259 {offsets = [0, 48], sizes = [8, 16], strides = [1, 1]} : vector<8x96xf32> to vector<8x16xf32>
    %283 = vector.extract_strided_slice %259 {offsets = [0, 80], sizes = [8, 16], strides = [1, 1]} : vector<8x96xf32> to vector<8x16xf32>
    %cst_141 = arith.constant dense<0.000000e+00> : vector<8x8xf32>
    %284 = tpu.matmul %281, %282, %cst_141 {dimension_numbers = #tpu.dot_dimension_numbers<[1], [1], [0], [0], [0, 0, 1, 0], [], []>} : vector<8x16xf32>, vector<8x16xf32>, vector<8x8xf32> -> vector<8x8xf32>
    %cst_142 = arith.constant dense<0xFF800000> : vector<8xf32>
    %285 = vector.multi_reduction <maximumf>, %284, %cst_142 [1] : vector<8x8xf32> to vector<8xf32>
    %286 = vector.shape_cast %285 : vector<8xf32> to vector<8x1xf32>
    %287 = vector.broadcast %286 : vector<8x1xf32> to vector<8x8xf32>
    %288 = arith.subf %284, %287 : vector<8x8xf32>
    %289 = math.exp %288 : vector<8x8xf32>
    %cst_143 = arith.constant dense<0.000000e+00> : vector<8xf32>
    %290 = vector.multi_reduction <add>, %289, %cst_143 [1] : vector<8x8xf32> to vector<8xf32>
    %291 = vector.shape_cast %290 : vector<8xf32> to vector<8x1xf32>
    %292 = tpu.reciprocal %291 {approx = true} : vector<8x1xf32> -> vector<8x1xf32>
    %293 = vector.broadcast %292 : vector<8x1xf32> to vector<8x8xf32>
    %294 = arith.mulf %289, %293 : vector<8x8xf32>
    %cst_144 = arith.constant dense<0.000000e+00> : vector<8x16xf32>
    %295 = tpu.matmul %294, %283, %cst_144 {dimension_numbers = #tpu.dot_dimension_numbers<[1], [0], [0], [1], [0, 0, 1, 1], [], []>} : vector<8x8xf32>, vector<8x16xf32>, vector<8x16xf32> -> vector<8x16xf32>
    %296 = vector.extract_strided_slice %8 {offsets = [16, 0], sizes = [16, 32], strides = [1, 1]} : vector<32x32xf32> to vector<16x32xf32>
    %cst_145 = arith.constant dense<0.000000e+00> : vector<8x32xf32>
    %297 = tpu.matmul %295, %296, %cst_145 {dimension_numbers = #tpu.dot_dimension_numbers<[1], [0], [0], [1], [0, 0, 1, 1], [], []>} : vector<8x16xf32>, vector<16x32xf32>, vector<8x32xf32> -> vector<8x32xf32>
    %298 = arith.addf %278, %297 : vector<8x32xf32>
    %299 = vector.broadcast %9 : vector<1x32xf32> to vector<8x32xf32>
    %300 = arith.addf %298, %299 : vector<8x32xf32>
    %cst_146 = arith.constant 0.000000e+00 : f32
    %301 = vector.broadcast %cst_146 : f32 to vector<8x32xf32>
    %302 = arith.maximumf %300, %301 : vector<8x32xf32>
    %cst_147 = arith.constant dense<0.000000e+00> : vector<8x32xf32>
    %303 = tpu.matmul %302, %10, %cst_147 {dimension_numbers = #tpu.dot_dimension_numbers<[1], [0], [0], [1], [0, 0, 1, 1], [], []>} : vector<8x32xf32>, vector<32x32xf32>, vector<8x32xf32> -> vector<8x32xf32>
    %304 = vector.broadcast %11 : vector<1x32xf32> to vector<8x32xf32>
    %305 = arith.addf %303, %304 : vector<8x32xf32>
    %306 = vector.extract_strided_slice %21 {offsets = [1, 0], sizes = [1, 32], strides = [1, 1]} : vector<2x32xf32> to vector<1x32xf32>
    %cst_148 = arith.constant dense<0.000000e+00> : vector<1x32xf32>
    %307 = tpu.matmul %306, %14, %cst_148 {dimension_numbers = #tpu.dot_dimension_numbers<[1], [0], [0], [1], [0, 0, 1, 1], [], []>} : vector<1x32xf32>, vector<32x32xf32>, vector<1x32xf32> -> vector<1x32xf32>
    %c992_149 = arith.constant 992 : index
    %c0_150 = arith.constant 0 : index
    %308 = vector.load %arg3[%c992_149, %c0_150] : memref<1280x128xf32, #tpu.memory_space<vmem>>, vector<32x32xf32>
    %309 = vector.extract_strided_slice %305 {offsets = [0, 0], sizes = [1, 32], strides = [1, 1]} : vector<8x32xf32> to vector<1x32xf32>
    %cst_151 = arith.constant dense<0.000000e+00> : vector<1x32xf32>
    %310 = tpu.matmul %309, %308, %cst_151 {dimension_numbers = #tpu.dot_dimension_numbers<[1], [0], [0], [1], [0, 0, 1, 1], [], []>} : vector<1x32xf32>, vector<32x32xf32>, vector<1x32xf32> -> vector<1x32xf32>
    %311 = arith.addf %307, %310 : vector<1x32xf32>
    %c1024_152 = arith.constant 1024 : index
    %c0_153 = arith.constant 0 : index
    %312 = vector.load %arg3[%c1024_152, %c0_153] : memref<1280x128xf32, #tpu.memory_space<vmem>>, vector<32x32xf32>
    %313 = vector.extract_strided_slice %305 {offsets = [1, 0], sizes = [1, 32], strides = [1, 1]} : vector<8x32xf32> to vector<1x32xf32>
    %cst_154 = arith.constant dense<0.000000e+00> : vector<1x32xf32>
    %314 = tpu.matmul %313, %312, %cst_154 {dimension_numbers = #tpu.dot_dimension_numbers<[1], [0], [0], [1], [0, 0, 1, 1], [], []>} : vector<1x32xf32>, vector<32x32xf32>, vector<1x32xf32> -> vector<1x32xf32>
    %315 = arith.addf %311, %314 : vector<1x32xf32>
    %c1056_155 = arith.constant 1056 : index
    %c0_156 = arith.constant 0 : index
    %316 = vector.load %arg3[%c1056_155, %c0_156] : memref<1280x128xf32, #tpu.memory_space<vmem>>, vector<32x32xf32>
    %317 = vector.extract_strided_slice %305 {offsets = [2, 0], sizes = [1, 32], strides = [1, 1]} : vector<8x32xf32> to vector<1x32xf32>
    %cst_157 = arith.constant dense<0.000000e+00> : vector<1x32xf32>
    %318 = tpu.matmul %317, %316, %cst_157 {dimension_numbers = #tpu.dot_dimension_numbers<[1], [0], [0], [1], [0, 0, 1, 1], [], []>} : vector<1x32xf32>, vector<32x32xf32>, vector<1x32xf32> -> vector<1x32xf32>
    %319 = arith.addf %315, %318 : vector<1x32xf32>
    %c1088_158 = arith.constant 1088 : index
    %c0_159 = arith.constant 0 : index
    %320 = vector.load %arg3[%c1088_158, %c0_159] : memref<1280x128xf32, #tpu.memory_space<vmem>>, vector<32x32xf32>
    %321 = vector.extract_strided_slice %305 {offsets = [3, 0], sizes = [1, 32], strides = [1, 1]} : vector<8x32xf32> to vector<1x32xf32>
    %cst_160 = arith.constant dense<0.000000e+00> : vector<1x32xf32>
    %322 = tpu.matmul %321, %320, %cst_160 {dimension_numbers = #tpu.dot_dimension_numbers<[1], [0], [0], [1], [0, 0, 1, 1], [], []>} : vector<1x32xf32>, vector<32x32xf32>, vector<1x32xf32> -> vector<1x32xf32>
    %323 = arith.addf %319, %322 : vector<1x32xf32>
    %c1120_161 = arith.constant 1120 : index
    %c0_162 = arith.constant 0 : index
    %324 = vector.load %arg3[%c1120_161, %c0_162] : memref<1280x128xf32, #tpu.memory_space<vmem>>, vector<32x32xf32>
    %325 = vector.extract_strided_slice %305 {offsets = [4, 0], sizes = [1, 32], strides = [1, 1]} : vector<8x32xf32> to vector<1x32xf32>
    %cst_163 = arith.constant dense<0.000000e+00> : vector<1x32xf32>
    %326 = tpu.matmul %325, %324, %cst_163 {dimension_numbers = #tpu.dot_dimension_numbers<[1], [0], [0], [1], [0, 0, 1, 1], [], []>} : vector<1x32xf32>, vector<32x32xf32>, vector<1x32xf32> -> vector<1x32xf32>
    %327 = arith.addf %323, %326 : vector<1x32xf32>
    %c1152_164 = arith.constant 1152 : index
    %c0_165 = arith.constant 0 : index
    %328 = vector.load %arg3[%c1152_164, %c0_165] : memref<1280x128xf32, #tpu.memory_space<vmem>>, vector<32x32xf32>
    %329 = vector.extract_strided_slice %305 {offsets = [5, 0], sizes = [1, 32], strides = [1, 1]} : vector<8x32xf32> to vector<1x32xf32>
    %cst_166 = arith.constant dense<0.000000e+00> : vector<1x32xf32>
    %330 = tpu.matmul %329, %328, %cst_166 {dimension_numbers = #tpu.dot_dimension_numbers<[1], [0], [0], [1], [0, 0, 1, 1], [], []>} : vector<1x32xf32>, vector<32x32xf32>, vector<1x32xf32> -> vector<1x32xf32>
    %331 = arith.addf %327, %330 : vector<1x32xf32>
    %c1184_167 = arith.constant 1184 : index
    %c0_168 = arith.constant 0 : index
    %332 = vector.load %arg3[%c1184_167, %c0_168] : memref<1280x128xf32, #tpu.memory_space<vmem>>, vector<32x32xf32>
    %333 = vector.extract_strided_slice %305 {offsets = [6, 0], sizes = [1, 32], strides = [1, 1]} : vector<8x32xf32> to vector<1x32xf32>
    %cst_169 = arith.constant dense<0.000000e+00> : vector<1x32xf32>
    %334 = tpu.matmul %333, %332, %cst_169 {dimension_numbers = #tpu.dot_dimension_numbers<[1], [0], [0], [1], [0, 0, 1, 1], [], []>} : vector<1x32xf32>, vector<32x32xf32>, vector<1x32xf32> -> vector<1x32xf32>
    %335 = arith.addf %331, %334 : vector<1x32xf32>
    %c1216_170 = arith.constant 1216 : index
    %c0_171 = arith.constant 0 : index
    %336 = vector.load %arg3[%c1216_170, %c0_171] : memref<1280x128xf32, #tpu.memory_space<vmem>>, vector<32x32xf32>
    %337 = vector.extract_strided_slice %305 {offsets = [7, 0], sizes = [1, 32], strides = [1, 1]} : vector<8x32xf32> to vector<1x32xf32>
    %cst_172 = arith.constant dense<0.000000e+00> : vector<1x32xf32>
    %338 = tpu.matmul %337, %336, %cst_172 {dimension_numbers = #tpu.dot_dimension_numbers<[1], [0], [0], [1], [0, 0, 1, 1], [], []>} : vector<1x32xf32>, vector<32x32xf32>, vector<1x32xf32> -> vector<1x32xf32>
    %339 = arith.addf %335, %338 : vector<1x32xf32>
    %340 = tpu.concatenate %180, %339 in 0 : vector<1x32xf32>, vector<1x32xf32> -> vector<2x32xf32>
    %341 = vector.broadcast %15 : vector<1x32xf32> to vector<2x32xf32>
    %342 = arith.addf %340, %341 : vector<2x32xf32>
    %cst_173 = arith.constant 0.000000e+00 : f32
    %343 = vector.broadcast %cst_173 : f32 to vector<2x32xf32>
    %344 = arith.maximumf %342, %343 : vector<2x32xf32>
    %cst_174 = arith.constant dense<0.000000e+00> : vector<2x1xf32>
    %345 = tpu.matmul %344, %16, %cst_174 {dimension_numbers = #tpu.dot_dimension_numbers<[1], [0], [0], [1], [0, 0, 1, 1], [], []>} : vector<2x32xf32>, vector<32x1xf32>, vector<2x1xf32> -> vector<2x1xf32>
    %346 = vector.broadcast %17 : vector<1x1xf32> to vector<2x1xf32>
    %347 = arith.addf %345, %346 : vector<2x1xf32>
    %c0_175 = arith.constant 0 : index
    %c0_176 = arith.constant 0 : index
    %348 = vector.load %arg5[%c0_175, %c0_176] : memref<2x1xf32, #tpu.memory_space<vmem>>, vector<2x1xf32>
    tpu.vector_store %arg5[%c0_175, %c0_176], %347 {strides = array<i32>} : memref<2x1xf32, #tpu.memory_space<vmem>>, vector<2x1xf32>,
    return
  }
}

</mosaic_0001>

<bundles_post_ra>
// kernel: model_forward.1
= control target key start
LH: loop header
LB: loop body
LE: loop exit
PB: predicated region body
PF: predicated region fallthrough
CT: control target
= control target key end

     0   :  { %10 = vsyncpa [#allocation4], 0  ;;  %s6368_s0 = inlined_call_operand.vmem [shape: s32[2,8], index: 0, kind: input, shape index: {}]   ;;  %s6369_s1 = inlined_call_operand.vmem [shape: f32[2,768], index: 1, kind: input, shape index: {}]   ;;  %s6370_s2 = inlined_call_operand.vmem [shape: f32[100,32], index: 2, kind: input, shape index: {}]   ;;  %s6371_s3 = inlined_call_operand.hbm [shape: f32[1280,128], index: 3, kind: input, shape index: {}]   ;;  %s6372_s4 = inlined_call_operand.vmem [shape: f32[9,128], index: 4, kind: input, shape index: {}]   ;;  %s6373_s5 = inlined_call_operand.vmem [shape: f32[2,1], index: 5, kind: output, shape index: {}]  }
   0x1   :  { %s18_s20 = sshll.u32 %s6368_s0, 4  ;;  %s19_s20 = int_to_ptr.vmem [resolvable:$true] %s18_s20 }
   0x2   :  { %11 = vsyncpa [#allocation3], 0  ;;  %s5718_s21 = scalar_lea.vmem %s19_s20, 32  ;;  %p5723_p1 = scmp.lt.s32.totalorder %s19_s20, %s19_s20 }
   0x3   :  { %p5719_p0 = scmp.ne.s32.totalorder %s19_s20, %s5718_s21  ;;  %p5724_p2 = scmp.lt.s32.totalorder %s5718_s21, %s5718_s21 }
   0x5   :  { %p5725_p3 = por %p5724_p2, %p5723_p1 }
   0x7   :  { %p5726_p4 = pnand %p5725_p3, %p5719_p0 }
   0x9   :  { %5729 = shalt.err (!%p5726_p4)
}
   0xa   :  { %s5756_s22 = smov [#allocation2]   ;;  %s5757_s23 = smov [#allocation5]  }
   0xb   :  { %21 = dma.vmem_to_smem %s19_s20, 32, %s5756_s22, [#allocation4]  }
   0xc   :  { %s31_s24 = sshll.u32 %s5757_s23, 4  ;;  %s5730_s27 = scalar_lea.hbm %s6371_s3, 20480  ;;  %s32_s24 = int_to_ptr.vmem [resolvable:$true] %s31_s24 }
   0xd   :  { %p5731_p5 = scmp.ne.s32.totalorder %s6371_s3, %s5730_s27  ;;  %p5734_p6 = scmp.lt.u32.totalorder %s5730_s27, %s6371_s3 }
   0xf   :  { %p5736_p7 = pnand %p5734_p6, %p5731_p5 }
  0x11   :  { %5739 = shalt.err (!%p5736_p7)
}
  0x12   :  { %s5740_s6 = scalar_lea.vmem %s32_s24, 20480  ;;  %p5745_p9 = scmp.lt.s32.totalorder %s32_s24, %s32_s24 }
  0x13   :  { %p5741_p8 = scmp.ne.s32.totalorder %s32_s24, %s5740_s6  ;;  %p5746_p10 = scmp.lt.s32.totalorder %s5740_s6, %s5740_s6 }
  0x15   :  { %p5747_p11 = por %p5746_p10, %p5745_p9 }
  0x17   :  { %p5748_p12 = pnand %p5747_p11, %p5741_p8 }
  0x19   :  { %5751 = shalt.err (!%p5748_p12)
}
  0x1a   :  { %s5758_s7 = smov 128   ;;  %s5759_s8 = smov 8  }
  0x1b   :  { %37 = dma.hbm_to_vmem [thread:$0]  %s6371_s3, 20480, %s32_s24, [#allocation3], %s5758_s7, %s5758_s7, %s5759_s8  }
  0x1c   :  { %5752 = dma.done.wait [#allocation4], 32  }
  0x1d   :  { %5753 = vsyncadd [#allocation4], 4294967264 }
  0x1e   :  { %5754 = dma.done.wait [#allocation3], 20480  }
  0x1f   :  { %5755 = vsyncadd [#allocation3], 4294946816 }
  0x20   :  { %46 = sfence }
  0x21   :  { %v47_v0 = vld [vmem:[#allocation5] sm:$0xff]  ;;  %v48_v1 = vld [vmem:[#allocation5 + $0x8] sm:$0xff]  ;;  %v49_v2 = vld [vmem:[#allocation5 + $0x10] sm:$0xff]  ;;  %v5760_v3 = vmov 0.0|0.0   ;;  %vm5761_vm0 = vmmov 0   ;;  %v5762_v6 = vmov 0.0  }
  0x22   :  { %5453 = vmatprep.subr.bf16.mxu1 %v5760_v3  ;;  %v5815_v4 = vpack.c.bf16 %v48_v1, %v47_v0  ;;  %v50_v5 = vld [vmem:[#allocation5 + $0x18] sm:$0xff]  ;;  %4932 = vmatprep.mubr.msk.f32.mxu1 %vm5761_vm0, %v5762_v6  ;;  %s433_s3 = sld [smem:[#allocation2]]  ;;  %s4546_s11 = sld [smem:[#allocation2 + $0x1]]  ;;  %vm478_vm1 = vcmask 1040384   ;;  %vm480_vm2 = vcmask 1041408   ;;  %vm482_vm3 = vcmask 1042432  }
  0x23   :  { %s4547_s12 = sld [smem:[#allocation2 + $0x2]]  ;;  %s4548_s13 = sld [smem:[#allocation2 + $0x3]]  ;;  %v5820_v7 = vpack.c.bf16 %v50_v5, %v49_v2  ;;  %vm484_vm4 = vcmask 1043456   ;;  %vm486_vm5 = vcmask 1044480   ;;  %vm488_vm6 = vcmask 1045504   ;;  %v54_v62 = vld [vmem:[#allocation5 + $0x30] sm:$0xff] }
  0x24   :  { %5455 = vmatpush3.bf16.msra.mxu1 %v5815_v4  ;;  %s4549_s14 = sld [smem:[#allocation2 + $0x4]]  ;;  %s4550_s15 = sld [smem:[#allocation2 + $0x5]]  ;;  %vm490_vm7 = vcmask 1046528   ;;  %vm496_vm8 = vcmask 261120   ;;  %v4553_v30 = vld [vmem:[%s6372_s4] ss:$0 sm:$0xff] }
  0x25   :  { %5456 = vmatprep.subr.bf16.mxu1 %v5760_v3  ;;  %s4551_s16 = sld [smem:[#allocation2 + $0x6]]  ;;  %s4552_s17 = sld [smem:[#allocation2 + $0x7]]  ;;  %vm574_vm9 = vcmask 130048   ;;  %vm650_vm10 = vcmask 64512   ;;  %v55_v63 = vld [vmem:[#allocation5 + $0x38] sm:$0xff]  ;;  %v93_v5 = vld [vmem:[#allocation5 + $0x140] sm:$0xff] }
  0x26   :  { %s5765_s19 = smov 80   ;;  %s5767_s21 = smov 48   ;;  %v5888_v1 = vpack.c.bf16 %v55_v63, %v54_v62  ;;  %v91_v63 = vld [vmem:[#allocation5 + $0x130] sm:$0xff]  ;;  %vm4520_vm11 = vcmask 1024  }
  0x27   :  { %s4589_s7 = sld [smem:[#allocation2 + $0x81]]  ;;  %s4590_s8 = sld [smem:[#allocation2 + $0x82]] }
  0x28   :  { %5458 = vmatpush3.bf16.msra.mxu1 %v5820_v7  ;;  %s434_s20 = scalar_lea.vmem %s6370_s2, %s433_s3  ;;  %s437_s23 = scalar_lea.vmem %s6370_s2, %s4546_s11 }
  0x29   :  { %v435_v8 = vld [vmem:[%s434_s20] sm:$0x1]  ;;  %s440_s26 = scalar_lea.vmem %s6370_s2, %s4547_s12  ;;  %s443_s0 = scalar_lea.vmem %s6370_s2, %s4548_s13  ;;  %4935 = vmatprep.subr.mxu1 %v5762_v6 }
  0x2a   :  { %v438_v9 = vld [vmem:[%s437_s23] sm:$0x1]  ;;  %s446_s6 = scalar_lea.vmem %s6370_s2, %s4549_s14  ;;  %s449_s9 = scalar_lea.vmem %s6370_s2, %s4550_s15 }
  0x2b   :  { %v441_v10 = vld [vmem:[%s440_s26] sm:$0x1]  ;;  %v458_v12 = vrot.slane %v438_v9, 7  ;;  %s452_s11 = scalar_lea.vmem %s6370_s2, %s4551_s16  ;;  %s455_s18 = scalar_lea.vmem %s6370_s2, %s4552_s17 }
  0x2c   :  { %v444_v11 = vld [vmem:[%s443_s0] sm:$0x1]  ;;  %v461_v15 = vrot.slane %v441_v10, 6  ;;  %s5763_s16 = smov 64   ;;  %s5764_s17 = smov 96   ;;  %v196_v10 = vlaneseq }
  0x2d   :  { %v447_v13 = vld [vmem:[%s446_s6] sm:$0x1]  ;;  %v464_v16 = vrot.slane %v444_v11, 5  ;;  %v479_v21 = vsel %vm478_vm1, %v435_v8, %v458_v12  ;;  %s5766_s20 = smov 112   ;;  %v94_v8 = vld [vmem:[#allocation5 + $0x148] sm:$0xff]  ;;  %s4591_s10 = sld [smem:[#allocation2 + $0x83]] }
  0x2e   :  { %v450_v14 = vld [vmem:[%s449_s9] sm:$0x1]  ;;  %v467_v19 = vrot.slane %v447_v13, 4  ;;  %v481_v23 = vsel %vm480_vm2, %v479_v21, %v461_v15  ;;  %v5357_v11 = vpack.c.bf16 %v94_v8, %v93_v5  ;;  %v78_v12 = vld [vmem:[#allocation5 + $0xc8] sm:$0xff]  ;;  %v95_v13 = vld [vmem:[#allocation5 + $0x150] sm:$0xff]  ;;  %s4588_s9 = sld [smem:[#allocation2 + $0x80]]  ;;  %s2470_s12 = scalar_lea.vmem %s6370_s2, %s4589_s7 }
  0x2f   :  { %v453_v17 = vld [vmem:[%s452_s11] sm:$0x1]  ;;  %v470_v20 = vrot.slane %v450_v14, 3  ;;  %v483_v25 = vsel %vm482_vm3, %v481_v23, %v464_v16  ;;  %v96_v14 = vld [vmem:[#allocation5 + $0x158] sm:$0xff]  ;;  %v5768_v15 = vmov 1983009808   ;;  %s2473_s15 = scalar_lea.vmem %s6370_s2, %s4590_s8 }
  0x30   :  { %v456_v18 = vld [vmem:[%s455_s18] sm:$0x1]  ;;  %v473_v22 = vrot.slane %v453_v17, 2  ;;  %v485_v26 = vsel %vm484_vm4, %v483_v25, %v467_v19  ;;  %v194_v16 = vunpack.c.l.s4 %v5768_v15  ;;  %v79_v19 = vld [vmem:[#allocation5 + $0xd0] sm:$0xff]  ;;  %5358 = vmatprep.subr.bf16.mxu0 %v5357_v11  ;;  %v126_v5 = vld [vmem:[#allocation5 + $0x248] sm:$0xff]  ;;  %s4592_s13 = sld [smem:[#allocation2 + $0x84]] }
  0x31   :  { %v476_v24 = vrot.slane %v456_v18, 1  ;;  %v487_v27 = vsel %vm486_vm5, %v485_v26, %v470_v20  ;;  %v77_v9 = vld [vmem:[#allocation5 + $0xc0] sm:$0xff]  ;;  %v5361_v18 = vpack.c.bf16 %v96_v14, %v95_v13  ;;  %v80_v20 = vld [vmem:[#allocation5 + $0xd8] sm:$0xff]  ;;  %v127_v13 = vld [vmem:[#allocation5 + $0x250] sm:$0xff]  ;;  %s4593_s25 = sld [smem:[#allocation2 + $0x85]]  ;;  %s4594_s28 = sld [smem:[#allocation2 + $0x86]] }
  0x32   :  { %v489_v28 = vsel %vm488_vm6, %v487_v27, %v473_v22  ;;  %v5359_v17 = vpack.c.bf16 %v78_v12, %v77_v9  ;;  %v97_v21 = vld [vmem:[#allocation5 + $0x160] sm:$0xff]  ;;  %v98_v22 = vld [vmem:[#allocation5 + $0x168] sm:$0xff]  ;;  %v195_v23 = vunpack.c.0.s8 %v194_v16  ;;  %v5363_v25 = vpack.c.bf16 %v80_v20, %v79_v19  ;;  %v128_v14 = vld [vmem:[#allocation5 + $0x258] sm:$0xff]  ;;  %s4595_s6 = sld [smem:[#allocation2 + $0x87]] }
  0x33   :  { %v491_v29 = vsel %vm490_vm7, %v489_v28, %v476_v24  ;;  %v197_v24 = vshrl.u32 %v196_v10, 7  ;;  %v5365_v26 = vpack.c.bf16 %v98_v22, %v97_v21  ;;  %v81_v27 = vld [vmem:[#allocation5 + $0xe0] sm:$0xff]  ;;  %v82_v28 = vld [vmem:[#allocation5 + $0xe8] sm:$0xff]  ;;  %v112_v19 = vld [vmem:[#allocation5 + $0x1d8] sm:$0xff]  ;;  %s2476_s27 = scalar_lea.vmem %s6370_s2, %s4591_s10 }
  0x34   :  { %4933 = vmatmul.mubr.msk.f32.vlgmr.msra.gmra.mrb[0].mxu1 %vm496_vm8, %v491_v29  ;;  %5360 = vmatpush3.bf16.msra.mxu0 %v5359_v17  ;;  %v99_v29 = vld [vmem:[#allocation5 + $0x170] sm:$0xff]  ;;  %v109_v11 = vld [vmem:[#allocation5 + $0x1c0] sm:$0xff]  ;;  %v110_v12 = vld [vmem:[#allocation5 + $0x1c8] sm:$0xff]  ;;  %v5393_v17 = vpack.c.bf16 %v128_v14, %v127_v13  ;;  %s2467_s24 = scalar_lea.vmem %s6370_s2, %s4588_s9 }
  0x35   :  { %4937 = vmatprep.mubr.msk.f32.mxu1 %vm5761_vm0, %v5762_v6  ;;  %5362 = vmatprep.subr.bf16.mxu0 %v5361_v18  ;;  %v5391_v15 = vpack.c.bf16 %v110_v12, %v109_v11  ;;  %v111_v18 = vld [vmem:[#allocation5 + $0x1d0] sm:$0xff]  ;;  %v129_v20 = vld [vmem:[#allocation5 + $0x260] sm:$0xff]  ;;  %v130_v21 = vld [vmem:[#allocation5 + $0x268] sm:$0xff] }
  0x36   :  { %v5395_v22 = vpack.c.bf16 %v112_v19, %v111_v18  ;;  %v143_v11 = vld [vmem:[#allocation5 + $0x2d0] sm:$0xff]  ;;  %v144_v12 = vld [vmem:[#allocation5 + $0x2d8] sm:$0xff]  ;;  %v161_v13 = vld [vmem:[#allocation5 + $0x360] sm:$0xff]  ;;  %s2479_s30 = scalar_lea.vmem %s6370_s2, %s4592_s13 }
  0x37   :  { %v162_v14 = vld [vmem:[#allocation5 + $0x368] sm:$0xff]  ;;  %v163_v19 = vld [vmem:[#allocation5 + $0x370] sm:$0xff]  ;;  %s2482_s9 = scalar_lea.vmem %s6370_s2, %s4593_s25  ;;  %s2485_s11 = scalar_lea.vmem %s6370_s2, %s4594_s28 }
  0x38   :  { %5364 = vmatpush3.bf16.msra.mxu0 %v5363_v25  ;;  %v114_v25 = vld [vmem:[#allocation5 + $0x1e8] sm:$0xff] }
  0x39   :  { %5366 = vmatprep.subr.bf16.mxu0 %v5365_v26  ;;  %v131_v26 = vld [vmem:[#allocation5 + $0x270] sm:$0xff]  ;;  %v146_v18 = vld [vmem:[#allocation5 + $0x2e8] sm:$0xff] }
 0x107   :  { %v566_v31 = vpop.f32.mrb[0].mxu1 }
 0x108   :  { %v567_v32 = vadd.f32 %v4553_v30, %v566_v31  ;;  %v4934_v33 = vpop.f32.mrb[1].mxu1  ;;  %v100_v30 = vld [vmem:[#allocation5 + $0x178] sm:$0xff]  ;;  %v198_v31 = vsub.s32 %v195_v23, %v197_v24  ;;  %v5397_v23 = vpack.c.bf16 %v130_v21, %v129_v20  ;;  %v113_v24 = vld [vmem:[#allocation5 + $0x1e0] sm:$0xff] }
 0x109   :  { %v5369_v33 = vpack.c.bf16 %v100_v30, %v99_v29  ;;  %v115_v30 = vld [vmem:[#allocation5 + $0x1f0] sm:$0xff]  ;;  %v164_v20 = vld [vmem:[#allocation5 + $0x378] sm:$0xff] }
 0x10a   :  { %662 = vrot.lane.b32.xlu1 %v567_v32, %s5763_s16  ;;  %572 = vrot.lane.b32.xlu0 %v567_v32, %s5764_s17  ;;  %v570_v35 = vmul.f32 0.25, %v567_v32 }
 0x10e   :  { %740 = vrot.lane.b32.xlu1 %v567_v32, %s5765_s19 }
 0x17c   :  { %v573_v34 = vpop.permute.xlu0 %572  ;;  %v663_v36 = vpop.permute.xlu1 %662 }
 0x17d   :  { %4936 = vmatpush3.xpose.msk.msra.mxu1 %vm574_vm9, %v573_v34  ;;  %v83_v34 = vld [vmem:[#allocation5 + $0xf0] sm:$0xff] }
 0x17e   :  { %4940 = vmatprep.subr.mxu1 %v5762_v6 }
 0x180   :  { %4938 = vmatmul.mubr.msk.f32.vlgmr.msra.gmra.mrb[2].mxu1 %vm574_vm9, %v570_v35  ;;  %v741_v45 = vpop.permute.xlu1 %740 }
 0x181   :  { %4941 = vmatpush3.msra.mxu1 %v663_v36  ;;  %4942 = vmatprep.mubr.msk.f32.mxu1 %vm5761_vm0, %v5762_v6  ;;  %v101_v36 = vld [vmem:[#allocation5 + $0x180] sm:$0xff] }
 0x182   :  { %4945 = vmatprep.subr.mxu1 %v5762_v6 }
 0x253   :  { %v646_v37 = vpop.f32.mrb[2].mxu1 }
 0x254   :  { %v4939_v38 = vpop.f32.mrb[3].mxu1  ;;  %v651_v39 = vsel %vm650_vm10, %v646_v37, -inf }
 0x255   :  { %652 = vmax.xlane.f32.xlu0 %v651_v39  ;;  %v184_v38 = vld [vmem:[%s6369_s1] sm:$0xff] }
 0x256   :  { %v199_v39 = vrot.slane %v184_v38, %v198_v31 }
 0x2e2   :  { %v653_v40 = vpop.xlane.xlu0 %652 }
 0x2e3   :  { %v654_v41 = vsub.f32 %v646_v37, %v653_v40  ;;  %v102_v37 = vld [vmem:[#allocation5 + $0x188] sm:$0xff] }
 0x2e5   :  { %v655_v42 = vmul.f32 1.442695, %v654_v41  ;;  %v5373_v41 = vpack.c.bf16 %v102_v37, %v101_v36  ;;  %v117_v36 = vld [vmem:[#allocation5 + $0x200] sm:$0xff]  ;;  %v118_v37 = vld [vmem:[#allocation5 + $0x208] sm:$0xff] }
 0x2e7   :  { %5685 = vpow2.f32 %v655_v42  ;;  %v85_v42 = vld [vmem:[#allocation5 + $0x100] sm:$0xff] }
 0x2f1   :  { %v5686_v43 = vpop.eup %5685 }
 0x2f2   :  { %v657_v44 = vsel %vm650_vm10, %v5686_v43, 0.0 }
 0x2f3   :  { %658 = vadd.xlane.f32.xlu1 %v657_v44  ;;  %v207_v44 = vcombine.high %v199_v39, %v199_v39 }
 0x2f5   :  { %287 = vmatprep.mubr.f32.mxu0 %v207_v44  ;;  %v137_v44 = vld [vmem:[#allocation5 + $0x2a0] sm:$0xff] }
 0x304   :  { %738 = vrot.lane.b32.xlu1 %v570_v35, %s5766_s20  ;;  %v84_v35 = vld [vmem:[#allocation5 + $0xf8] sm:$0xff] }
 0x305   :  { %v5371_v40 = vpack.c.bf16 %v84_v35, %v83_v34 }
 0x380   :  { %v659_v46 = vpop.xlane.xlu1 %658 }
 0x381   :  { %5687 = vrcp.f32 %v659_v46  ;;  %v104_v46 = vld [vmem:[#allocation5 + $0x198] sm:$0xff] }
 0x384   :  { %v739_v49 = vpop.permute.xlu1 %738 }
 0x38b   :  { %v5688_v47 = vpop.eup %5687 }
 0x38c   :  { %v661_v48 = vmul.f32 %v5688_v47, %v5686_v43  ;;  %v86_v43 = vld [vmem:[#allocation5 + $0x108] sm:$0xff] }
 0x38d   :  { %v5375_v47 = vpack.c.bf16 %v86_v43, %v85_v42  ;;  %v119_v42 = vld [vmem:[#allocation5 + $0x210] sm:$0xff]  ;;  %v120_v43 = vld [vmem:[#allocation5 + $0x218] sm:$0xff] }
 0x38e   :  { %4943 = vmatmul.mubr.msk.f32.vlgmr.msra.gmra.mrb[4].mxu1 %vm650_vm10, %v661_v48 }
 0x38f   :  { %4946 = vmatpush3.xpose.msk.msra.mxu1 %vm574_vm9, %v741_v45  ;;  %4947 = vmatprep.mubr.msk.f32.mxu1 %vm5761_vm0, %v5762_v6  ;;  %v103_v45 = vld [vmem:[#allocation5 + $0x190] sm:$0xff] }
 0x390   :  { %4950 = vmatprep.subr.mxu1 %v5762_v6  ;;  %v5377_v48 = vpack.c.bf16 %v104_v46, %v103_v45  ;;  %v138_v45 = vld [vmem:[#allocation5 + $0x2a8] sm:$0xff]  ;;  %v5411_v46 = vpack.c.bf16 %v120_v43, %v119_v42  ;;  %v171_v42 = vld [vmem:[#allocation5 + $0x3b0] sm:$0xff]  ;;  %v172_v43 = vld [vmem:[#allocation5 + $0x3b8] sm:$0xff] }
 0x392   :  { %4948 = vmatmul.mubr.msk.f32.vlgmr.msra.gmra.mrb[6].mxu1 %vm574_vm9, %v739_v49  ;;  %v87_v49 = vld [vmem:[#allocation5 + $0x110] sm:$0xff] }
 0x393   :  { %4952 = vmatprep.mubr.msk.f32.mxu1 %vm5761_vm0, %v5762_v6 }
 0x461   :  { %v5882_v50 = vpop.f32.mrb[4].mxu1 }
 0x462   :  { %v4944_v51 = vpop.f32.mrb[5].mxu1 }
 0x463   :  { %v88_v51 = vld [vmem:[#allocation5 + $0x118] sm:$0xff] }
 0x465   :  { %v812_v52 = vpop.f32.mrb[6].mxu1 }
 0x466   :  { %v4949_v53 = vpop.f32.mrb[7].mxu1  ;;  %v816_v54 = vsel %vm650_vm10, %v812_v52, -inf }
 0x467   :  { %817 = vmax.xlane.f32.xlu1 %v816_v54  ;;  %v106_v53 = vld [vmem:[#allocation5 + $0x1a8] sm:$0xff]  ;;  %v5379_v54 = vpack.c.bf16 %v88_v51, %v87_v49  ;;  %v139_v51 = vld [vmem:[#allocation5 + $0x2b0] sm:$0xff] }
 0x468   :  { %v122_v49 = vld [vmem:[#allocation5 + $0x228] sm:$0xff] }
 0x4f4   :  { %v818_v55 = vpop.xlane.xlu1 %817 }
 0x4f5   :  { %v819_v56 = vsub.f32 %v812_v52, %v818_v55  ;;  %v105_v52 = vld [vmem:[#allocation5 + $0x1a0] sm:$0xff] }
 0x4f6   :  { %v5381_v55 = vpack.c.bf16 %v106_v53, %v105_v52  ;;  %v140_v52 = vld [vmem:[#allocation5 + $0x2b8] sm:$0xff] }
 0x4f7   :  { %v820_v57 = vmul.f32 1.442695, %v819_v56  ;;  %v89_v56 = vld [vmem:[#allocation5 + $0x120] sm:$0xff] }
 0x4f9   :  { %5689 = vpow2.f32 %v820_v57  ;;  %v90_v57 = vld [vmem:[#allocation5 + $0x128] sm:$0xff] }
 0x503   :  { %v5690_v58 = vpop.eup %5689 }
 0x504   :  { %v822_v59 = vsel %vm650_vm10, %v5690_v58, 0.0 }
 0x505   :  { %823 = vadd.xlane.f32.xlu0 %v822_v59  ;;  %v108_v59 = vld [vmem:[#allocation5 + $0x1b8] sm:$0xff] }
 0x51b   :  { %827 = vrot.lane.b32.xlu0 %v567_v32, %s5767_s21  ;;  %v5367_v32 = vpack.c.bf16 %v82_v28, %v81_v27  ;;  %v132_v27 = vld [vmem:[#allocation5 + $0x278] sm:$0xff]  ;;  %v5399_v28 = vpack.c.bf16 %v114_v25, %v113_v24  ;;  %v165_v25 = vld [vmem:[#allocation5 + $0x380] sm:$0xff] }
 0x51c   :  { %v5401_v29 = vpack.c.bf16 %v132_v27, %v131_v26  ;;  %v148_v24 = vld [vmem:[#allocation5 + $0x2f8] sm:$0xff]  ;;  %v166_v26 = vld [vmem:[#allocation5 + $0x388] sm:$0xff] }
 0x51d   :  { %5368 = vmatpush3.bf16.msra.mxu0 %v5367_v32  ;;  %v133_v32 = vld [vmem:[#allocation5 + $0x280] sm:$0xff] }
 0x51e   :  { %5370 = vmatprep.subr.bf16.mxu0 %v5369_v33  ;;  %v134_v33 = vld [vmem:[#allocation5 + $0x288] sm:$0xff] }
 0x51f   :  { %v5405_v35 = vpack.c.bf16 %v134_v33, %v133_v32 }
 0x521   :  { %5372 = vmatpush3.bf16.msra.mxu0 %v5371_v40  ;;  %v5407_v40 = vpack.c.bf16 %v118_v37, %v117_v36  ;;  %v169_v36 = vld [vmem:[#allocation5 + $0x3a0] sm:$0xff]  ;;  %v170_v37 = vld [vmem:[#allocation5 + $0x3a8] sm:$0xff] }
 0x522   :  { %5374 = vmatprep.subr.bf16.mxu0 %v5373_v41 }
 0x525   :  { %5376 = vmatpush3.bf16.msra.mxu0 %v5375_v47  ;;  %v5413_v47 = vpack.c.bf16 %v138_v45, %v137_v44  ;;  %v5449_v45 = vpack.c.bf16 %v172_v43, %v171_v42 }
 0x526   :  { %5378 = vmatprep.subr.bf16.mxu0 %v5377_v48  ;;  %v121_v48 = vld [vmem:[#allocation5 + $0x220] sm:$0xff] }
 0x527   :  { %v5415_v53 = vpack.c.bf16 %v122_v49, %v121_v48  ;;  %v52_v49 = vld [vmem:[#allocation5 + $0x20] sm:$0xff] }
 0x529   :  { %5380 = vmatpush3.bf16.msra.mxu0 %v5379_v54  ;;  %v5417_v54 = vpack.c.bf16 %v140_v52, %v139_v51  ;;  %v53_v51 = vld [vmem:[#allocation5 + $0x28] sm:$0xff] }
 0x52a   :  { %5382 = vmatprep.subr.bf16.mxu0 %v5381_v55  ;;  %v123_v55 = vld [vmem:[#allocation5 + $0x230] sm:$0xff]  ;;  %v5914_v52 = vpack.c.bf16 %v53_v51, %v52_v49 }
 0x592   :  { %v824_v60 = vpop.xlane.xlu0 %823 }
 0x593   :  { %5691 = vrcp.f32 %v824_v60  ;;  %v5383_v60 = vpack.c.bf16 %v90_v57, %v89_v56  ;;  %v124_v56 = vld [vmem:[#allocation5 + $0x238] sm:$0xff]  ;;  %v157_v57 = vld [vmem:[#allocation5 + $0x340] sm:$0xff] }
 0x595   :  { %5384 = vmatpush3.bf16.msra.mxu0 %v5383_v60 }
 0x596   :  { %v828_v61 = vpop.permute.xlu0 %827 }
 0x597   :  { %4951 = vmatpush3.msra.mxu1 %v828_v61  ;;  %v192_v61 = vcombine.high %v184_v38, %v184_v38  ;;  %v135_v38 = vld [vmem:[#allocation5 + $0x290] sm:$0xff] }
 0x598   :  { %5459 = vmatprep.subr.bf16.mxu1 %v5760_v3 }
 0x599   :  { %v5898_v9 = vrot.slane %v192_v61, %v198_v31  ;;  %v116_v31 = vld [vmem:[#allocation5 + $0x1f8] sm:$0xff]  ;;  %v141_v61 = vld [vmem:[#allocation5 + $0x2c0] sm:$0xff] }
 0x59a   :  { %v5403_v34 = vpack.c.bf16 %v116_v31, %v115_v30  ;;  %v167_v30 = vld [vmem:[#allocation5 + $0x390] sm:$0xff]  ;;  %v168_v31 = vld [vmem:[#allocation5 + $0x398] sm:$0xff] }
 0x59b   :  { %v208_v16 = vcombine.high %v5898_v9, %v5898_v9  ;;  %v5441_v33 = vpack.c.bf16 %v168_v31, %v167_v30 }
 0x59d   :  { %v5692_v0 = vpop.eup %5691 }
 0x59e   :  { %v826_v2 = vmul.f32 %v5692_v0, %v5690_v58  ;;  %v107_v58 = vld [vmem:[#allocation5 + $0x1b0] sm:$0xff]  ;;  %v92_v0 = vld [vmem:[#allocation5 + $0x138] sm:$0xff] }
 0x59f   :  { %v5385_v62 = vpack.c.bf16 %v108_v59, %v107_v58  ;;  %v5387_v8 = vpack.c.bf16 %v92_v0, %v91_v63  ;;  %v158_v58 = vld [vmem:[#allocation5 + $0x348] sm:$0xff]  ;;  %v5419_v59 = vpack.c.bf16 %v124_v56, %v123_v55  ;;  %v159_v0 = vld [vmem:[#allocation5 + $0x350] sm:$0xff]  ;;  %v57_v55 = vld [vmem:[#allocation5 + $0x40] sm:$0xff] }
 0x5a0   :  { %4953 = vmatmul.mubr.msk.f32.vlgmr.msra.gmra.mrb[8].mxu1 %vm650_vm10, %v826_v2  ;;  %v125_v2 = vld [vmem:[#allocation5 + $0x240] sm:$0xff]  ;;  %v5421_v60 = vpack.c.bf16 %v158_v58, %v157_v57  ;;  %v5905_v63 = vld.sshfl [vmem:[%s6369_s1 + $0x8] sm:$0x33 pattern:$0x76325410]  ;;  %v59_v58 = vld [vmem:[#allocation5 + $0x50] sm:$0xff] }
 0x5a1   :  { %5461 = vmatpush3.bf16.msra.mxu1 %v5888_v1  ;;  %4959 = vmatprep.mubr.msk.f32.mxu1 %vm5761_vm0, %v5762_v6  ;;  %v5389_v10 = vpack.c.bf16 %v126_v5, %v125_v2  ;;  %v160_v2 = vld [vmem:[#allocation5 + $0x358] sm:$0xff]  ;;  %v58_v56 = vld [vmem:[#allocation5 + $0x48] sm:$0xff] }
 0x5a2   :  { %5462 = vmatprep.subr.bf16.mxu1 %v5760_v3  ;;  %5386 = vmatprep.subr.bf16.mxu0 %v5385_v62  ;;  %v142_v62 = vld [vmem:[#allocation5 + $0x2c8] sm:$0xff]  ;;  %v5925_v57 = vpack.c.bf16 %v58_v56, %v57_v55 }
 0x5a3   :  { %5388 = vmatpush3.bf16.msra.mxu0 %v5387_v8  ;;  %v5423_v5 = vpack.c.bf16 %v142_v62, %v141_v61  ;;  %v216_v8 = vcombine.high %v5905_v63, %v5905_v63  ;;  %v63_v61 = vld [vmem:[#allocation5 + $0x68] sm:$0xff] }
 0x5a4   :  { %5390 = vmatprep.subr.bf16.mxu0 %v5389_v10  ;;  %v5425_v10 = vpack.c.bf16 %v160_v2, %v159_v0 }
 0x5a6   :  { %288 = vmatmul.mubr.f32.vlgmr.msra.gmra.mrb[0].mxu0 %v199_v39  ;;  %v136_v39 = vld [vmem:[#allocation5 + $0x298] sm:$0xff] }
 0x5a7   :  { %5392 = vmatpush3.bf16.msra.mxu0 %v5391_v15  ;;  %357 = vmatprep.mubr.f32.mxu0 %v208_v16  ;;  %v5409_v41 = vpack.c.bf16 %v136_v39, %v135_v38  ;;  %v5427_v15 = vpack.c.bf16 %v144_v12, %v143_v11  ;;  %v5429_v16 = vpack.c.bf16 %v162_v14, %v161_v13 }
 0x5a8   :  { %5394 = vmatprep.subr.bf16.mxu0 %v5393_v17  ;;  %v145_v17 = vld [vmem:[#allocation5 + $0x2e0] sm:$0xff]  ;;  %v5445_v39 = vpack.c.bf16 %v170_v37, %v169_v36 }
 0x5a9   :  { %v5431_v21 = vpack.c.bf16 %v146_v18, %v145_v17 }
 0x5ab   :  { %5396 = vmatpush3.bf16.msra.mxu0 %v5395_v22  ;;  %v5433_v22 = vpack.c.bf16 %v164_v20, %v163_v19  ;;  %v5945_v20 = vld [vmem:[%s6372_s4 + $0x1] ss:$0 sm:$0xff] }
 0x5ac   :  { %5398 = vmatprep.subr.bf16.mxu0 %v5397_v23  ;;  %v147_v23 = vld [vmem:[#allocation5 + $0x2f0] sm:$0xff] }
 0x5ad   :  { %v5435_v27 = vpack.c.bf16 %v148_v24, %v147_v23 }
 0x5af   :  { %5400 = vmatpush3.bf16.msra.mxu0 %v5399_v28  ;;  %v149_v28 = vld [vmem:[#allocation5 + $0x300] sm:$0xff] }
 0x5b0   :  { %5402 = vmatprep.subr.bf16.mxu0 %v5401_v29  ;;  %v150_v29 = vld [vmem:[#allocation5 + $0x308] sm:$0xff] }
 0x5b1   :  { %v5439_v32 = vpack.c.bf16 %v150_v29, %v149_v28  ;;  %v5958_v28 = vld [vmem:[%s6372_s4 + $0x2] ss:$0 sm:$0xff] }
 0x5b3   :  { %5404 = vmatpush3.bf16.msra.mxu0 %v5403_v34  ;;  %v151_v34 = vld [vmem:[#allocation5 + $0x310] sm:$0xff] }
 0x5b4   :  { %5406 = vmatprep.subr.bf16.mxu0 %v5405_v35  ;;  %v152_v35 = vld [vmem:[#allocation5 + $0x318] sm:$0xff] }
 0x5b5   :  { %v5443_v38 = vpack.c.bf16 %v152_v35, %v151_v34 }
 0x5b7   :  { %5408 = vmatpush3.bf16.msra.mxu0 %v5407_v40  ;;  %v153_v40 = vld [vmem:[#allocation5 + $0x320] sm:$0xff] }
 0x5b8   :  { %5410 = vmatprep.subr.bf16.mxu0 %v5409_v41  ;;  %v154_v41 = vld [vmem:[#allocation5 + $0x328] sm:$0xff] }
 0x5b9   :  { %v5447_v44 = vpack.c.bf16 %v154_v41, %v153_v40 }
 0x5bb   :  { %5412 = vmatpush3.bf16.msra.mxu0 %v5411_v46  ;;  %v155_v46 = vld [vmem:[#allocation5 + $0x330] sm:$0xff] }
 0x5bc   :  { %5414 = vmatprep.subr.bf16.mxu0 %v5413_v47  ;;  %v156_v47 = vld [vmem:[#allocation5 + $0x338] sm:$0xff] }
 0x5bd   :  { %v5451_v48 = vpack.c.bf16 %v156_v47, %v155_v46 }
 0x5bf   :  { %5416 = vmatpush3.bf16.msra.mxu0 %v5415_v53 }
 0x5c0   :  { %5418 = vmatprep.subr.bf16.mxu0 %v5417_v54 }
 0x5c3   :  { %5420 = vmatpush3.bf16.msra.mxu0 %v5419_v59  ;;  %v60_v59 = vld [vmem:[#allocation5 + $0x58] sm:$0xff] }
 0x5c4   :  { %5422 = vmatprep.subr.bf16.mxu0 %v5421_v60  ;;  %v5929_v60 = vpack.c.bf16 %v60_v59, %v59_v58 }
 0x5c6   :  { %358 = vmatmul.mubr.f32.vlgmr.msra.gmra.mrb[2].mxu0 %v5898_v9  ;;  %v5437_v9 = vpack.c.bf16 %v166_v26, %v165_v25  ;;  %v64_v26 = vld [vmem:[#allocation5 + $0x70] sm:$0xff] }
 0x5c7   :  { %5424 = vmatpush3.bf16.msra.mxu0 %v5423_v5  ;;  %427 = vmatprep.mubr.f32.mxu0 %v216_v8  ;;  %v4544_v5 = vld [vmem:[%s6372_s4 + $0x6] ss:$0 sm:$0xff] }
 0x5c8   :  { %5426 = vmatprep.subr.bf16.mxu0 %v5425_v10 }
 0x5cb   :  { %5428 = vmatpush3.bf16.msra.mxu0 %v5427_v15 }
 0x5cc   :  { %5430 = vmatprep.subr.bf16.mxu0 %v5429_v16 }
 0x5cf   :  { %5432 = vmatpush3.bf16.msra.mxu0 %v5431_v21 }
 0x5d0   :  { %5434 = vmatprep.subr.bf16.mxu0 %v5433_v22 }
 0x5d3   :  { %5436 = vmatpush3.bf16.msra.mxu0 %v5435_v27  ;;  %v65_v27 = vld [vmem:[#allocation5 + $0x78] sm:$0xff] }
 0x5d4   :  { %5438 = vmatprep.subr.bf16.mxu0 %v5437_v9  ;;  %v5951_v9 = vpack.c.bf16 %v65_v27, %v64_v26  ;;  %v74_v26 = vld [vmem:[#allocation5 + $0xb0] sm:$0xff]  ;;  %v75_v27 = vld [vmem:[#allocation5 + $0xb8] sm:$0xff] }
 0x5d7   :  { %5440 = vmatpush3.bf16.msra.mxu0 %v5439_v32 }
 0x5d8   :  { %5442 = vmatprep.subr.bf16.mxu0 %v5441_v33  ;;  %v5967_v33 = vld [vmem:[%s6372_s4 + $0x3] ss:$0 sm:$0xff] }
 0x5db   :  { %5444 = vmatpush3.bf16.msra.mxu0 %v5443_v38 }
 0x5dc   :  { %5446 = vmatprep.subr.bf16.mxu0 %v5445_v39 }
 0x5df   :  { %5448 = vmatpush3.bf16.msra.mxu0 %v5447_v44 }
 0x5e0   :  { %5450 = vmatprep.subr.bf16.mxu0 %v5449_v45 }
 0x5e3   :  { %5452 = vmatpush3.bf16.msra.mxu0 %v5451_v48 }
 0x5e4   :  { %5465 = vmatprep.subr.bf16.mxu0 %v5760_v3 }
 0x5e6   :  { %428 = vmatmul.mubr.f32.vlgmr.msra.gmra.mrb[4].mxu0 %v5905_v63 }
 0x5e7   :  { %4977 = vmatprep.mubr.msk.f32.mxu0 %vm5761_vm0, %v5762_v6  ;;  %5467 = vmatpush3.bf16.msra.mxu0 %v5925_v57 }
 0x5e8   :  { %5468 = vmatprep.subr.bf16.mxu0 %v5760_v3 }
 0x5eb   :  { %5470 = vmatpush3.bf16.msra.mxu0 %v5929_v60 }
 0x5ec   :  { %5001 = vmatprep.subr.mxu0 %v5762_v6 }
 0x673   :  { %v899_v53 = vpop.f32.mrb[8].mxu1 }
 0x674   :  { %v4954_v54 = vpop.f32.mrb[9].mxu1  ;;  %4960 = vmatmul.mubr.msk.f32.vlgmr.msra.gmra.mrb[10].mxu1 %vm574_vm9, %v899_v53 }
 0x675   :  { %5464 = vmatpush3.bf16.msra.mxu1 %v5914_v52  ;;  %4966 = vmatprep.mubr.msk.f32.mxu1 %vm5761_vm0, %v5762_v6 }
 0x676   :  { %5471 = vmatprep.subr.bf16.mxu1 %v5760_v3 }
 0x678   :  { %4967 = vmatmul.mubr.msk.f32.vlgmr.msra.gmra.mrb[12].mxu1 %vm574_vm9, %v5882_v50  ;;  %v62_v50 = vld [vmem:[#allocation5 + $0x60] sm:$0xff] }
 0x679   :  { %4988 = vmatprep.mubr.msk.f32.mxu1 %vm5761_vm0, %v5762_v6  ;;  %v5933_v62 = vpack.c.bf16 %v63_v61, %v62_v50  ;;  %v4660_v63 = vpop.f32.mrb[0].mxu0 }
 0x67a   :  { %v4661_v0 = vpop.f32.mrb[1].mxu0 }
 0x67b   :  { %5473 = vmatpush3.bf16.msra.mxu1 %v5933_v62  ;;  %v4662_v2 = vadd.f32 %v4661_v0, %v4660_v63 }
 0x67c   :  { %5474 = vmatprep.subr.bf16.mxu1 %v5760_v3 }
 0x67d   :  { %v290_v8 = vadd.f32 %v4662_v2, %v4544_v5  ;;  %v67_v5 = vld [vmem:[#allocation5 + $0x80] sm:$0xff] }
 0x67f   :  { %5476 = vmatpush3.bf16.msra.mxu1 %v5951_v9 }
 0x680   :  { %4991 = vmatprep.subr.mxu1 %v5762_v6 }
 0x699   :  { %v4695_v10 = vpop.f32.mrb[2].mxu0 }
 0x69a   :  { %v4696_v11 = vpop.f32.mrb[3].mxu0 }
 0x69b   :  { %v4697_v12 = vadd.f32 %v4696_v11, %v4695_v10 }
 0x69d   :  { %v360_v13 = vadd.f32 %v4697_v12, %v290_v8  ;;  %v68_v8 = vld [vmem:[#allocation5 + $0x88] sm:$0xff] }
 0x69e   :  { %v5993_v12 = vpack.c.bf16 %v68_v8, %v67_v5 }
 0x6b9   :  { %v4730_v14 = vpop.f32.mrb[4].mxu0 }
 0x6ba   :  { %v4731_v15 = vpop.f32.mrb[5].mxu0 }
 0x6bb   :  { %v4732_v16 = vadd.f32 %v4731_v15, %v4730_v14  ;;  %v69_v14 = vld [vmem:[#allocation5 + $0x90] sm:$0xff]  ;;  %v70_v15 = vld [vmem:[#allocation5 + $0x98] sm:$0xff] }
 0x6bd   :  { %v5940_v17 = vadd.f32 %v4732_v16, %v360_v13  ;;  %v6001_v16 = vpack.c.bf16 %v70_v15, %v69_v14  ;;  %v175_v14 = vld [vmem:[#allocation5 + $0x3c8] sm:$0xff] }
 0x747   :  { %v972_v18 = vpop.f32.mrb[10].mxu1 }
 0x748   :  { %v4961_v19 = vpop.f32.mrb[11].mxu1 }
 0x74b   :  { %v1045_v21 = vpop.f32.mrb[12].mxu1 }
 0x74c   :  { %v1046_v22 = vadd.f32 %v1045_v21, %v972_v18  ;;  %v4968_v23 = vpop.f32.mrb[13].mxu1 }
 0x74d   :  { %v72_v23 = vld [vmem:[#allocation5 + $0xa0] sm:$0xff] }
 0x74e   :  { %v1053_v24 = vadd.f32 %v5945_v20, %v1046_v22 }
 0x750   :  { %v1054_v25 = vmax.f32 %v1053_v24, 0.0  ;;  %v73_v24 = vld [vmem:[#allocation5 + $0xa8] sm:$0xff] }
 0x752   :  { %4978 = vmatmul.mubr.msk.f32.vlgmr.msra.gmra.mrb[6].mxu0 %vm496_vm8, %v1054_v25  ;;  %v6011_v25 = vpack.c.bf16 %v73_v24, %v72_v23  ;;  %v177_v23 = vld [vmem:[#allocation5 + $0x3d8] sm:$0xff] }
 0x753   :  { %5003 = vmatprep.mubr.msk.f32.mxu0 %vm5761_vm0, %v5762_v6 }
 0x825   :  { %v1128_v29 = vpop.f32.mrb[6].mxu0 }
 0x826   :  { %v1129_v30 = vadd.f32 %v5958_v28, %v1128_v29  ;;  %v4979_v31 = vpop.f32.mrb[7].mxu0  ;;  %v6015_v29 = vpack.c.bf16 %v75_v27, %v74_v26  ;;  %v1920_v26 = vld [vmem:[#allocation5 + $0x400] sm:$0xff]  ;;  %v1921_v27 = vld [vmem:[#allocation5 + $0x408] sm:$0xff] }
 0x827   :  { %v1771_v31 = vld [vmem:[#allocation5 + $0x3e8] sm:$0xff] }
 0x828   :  { %v1132_v32 = vmax.f32 %v1129_v30, 0.0  ;;  %v1770_v30 = vld [vmem:[#allocation5 + $0x3e0] sm:$0xff] }
 0x82a   :  { %4989 = vmatmul.mubr.msk.f32.vlgmr.msra.gmra.mrb[14].mxu1 %vm496_vm8, %v1132_v32  ;;  %v6019_v32 = vpack.c.bf16 %v1771_v31, %v1770_v30  ;;  %v6093_v31 = vpack.c.bf16 %v1921_v27, %v1920_v26  ;;  %v2312_v27 = vld [vmem:[#allocation5 + $0x4b0] sm:$0xff] }
 0x82b   :  { %4993 = vmatprep.mubr.msk.f32.mxu1 %vm5761_vm0, %v5762_v6 }
 0x8fd   :  { %v1206_v34 = vpop.f32.mrb[14].mxu1 }
 0x8fe   :  { %v1207_v35 = vadd.f32 %v5967_v33, %v1206_v34  ;;  %v4990_v36 = vpop.f32.mrb[15].mxu1  ;;  %v2471_v34 = vld [vmem:[%s2470_s12] sm:$0x1] }
 0x8ff   :  { %v2491_v36 = vrot.slane %v2471_v34, 7  ;;  %v5717_v34 = vld [vmem:[%s6372_s4] ss:$0 sm:$0xff] }
 0x900   :  { %1212 = vrot.lane.b32.xlu0 %v1207_v35, %s5764_s17  ;;  %v1210_v37 = vmul.f32 0.25, %v1207_v35 }
 0x902   :  { %1376 = vrot.lane.b32.xlu1 %v1210_v37, %s5766_s20 }
 0x904   :  { %1378 = vrot.lane.b32.xlu0 %v1207_v35, %s5765_s19 }
 0x972   :  { %v1213_v38 = vpop.permute.xlu0 %1212 }
 0x973   :  { %4992 = vmatpush3.xpose.msk.msra.mxu1 %vm574_vm9, %v1213_v38  ;;  %v2477_v38 = vld [vmem:[%s2476_s27] sm:$0x1] }
 0x974   :  { %4996 = vmatprep.subr.mxu1 %v5762_v6  ;;  %v1377_v40 = vpop.permute.xlu1 %1376 }
 0x976   :  { %v1379_v39 = vpop.permute.xlu0 %1378  ;;  %4994 = vmatmul.mubr.msk.f32.vlgmr.msra.gmra.mrb[16].mxu1 %vm574_vm9, %v1210_v37  ;;  %v2468_v37 = vld [vmem:[%s2467_s24] sm:$0x1] }
 0x977   :  { %5002 = vmatpush3.xpose.msk.msra.mxu0 %vm574_vm9, %v1379_v39  ;;  %4998 = vmatprep.mubr.msk.f32.mxu1 %vm5761_vm0, %v5762_v6 }
 0x978   :  { %5477 = vmatprep.subr.bf16.mxu0 %v5760_v3 }
 0x97a   :  { %5004 = vmatmul.mubr.msk.f32.vlgmr.msra.gmra.mrb[8].mxu0 %vm574_vm9, %v1377_v40  ;;  %v2511_v40 = vsel %vm478_vm1, %v2468_v37, %v2491_v36  ;;  %v1922_v37 = vld [vmem:[#allocation5 + $0x410] sm:$0xff] }
 0x97b   :  { %5015 = vmatprep.mubr.msk.f32.mxu0 %vm5761_vm0, %v5762_v6  ;;  %5479 = vmatpush3.bf16.msra.mxu0 %v6001_v16 }
 0x97c   :  { %5483 = vmatprep.subr.bf16.mxu0 %v5760_v3 }
 0xa49   :  { %v1285_v41 = vpop.f32.mrb[16].mxu1 }
 0xa4a   :  { %v4995_v42 = vpop.f32.mrb[17].mxu1  ;;  %v1289_v43 = vsel %vm650_vm10, %v1285_v41, -inf }
 0xa4b   :  { %1290 = vmax.xlane.f32.xlu0 %v1289_v43  ;;  %v2480_v42 = vld [vmem:[%s2479_s30] sm:$0x1]  ;;  %v2497_v43 = vrot.slane %v2477_v38, 5  ;;  %v1923_v38 = vld [vmem:[#allocation5 + $0x418] sm:$0xff] }
 0xa4d   :  { %v1450_v44 = vpop.f32.mrb[8].mxu0 }
 0xa4e   :  { %v5005_v45 = vpop.f32.mrb[9].mxu0  ;;  %v1454_v46 = vsel %vm650_vm10, %v1450_v44, -inf }
 0xa4f   :  { %1455 = vmax.xlane.f32.xlu1 %v1454_v46  ;;  %v2483_v46 = vld [vmem:[%s2482_s9] sm:$0x1] }
 0xa60   :  { %1465 = vrot.lane.b32.xlu1 %v1207_v35, %s5767_s21 }
 0xad8   :  { %v1291_v47 = vpop.xlane.xlu0 %1290 }
 0xad9   :  { %v1292_v48 = vsub.f32 %v1285_v41, %v1291_v47  ;;  %v2500_v47 = vrot.slane %v2480_v42, 4 }
 0xadb   :  { %v1293_v49 = vmul.f32 1.442695, %v1292_v48  ;;  %v6049_v48 = vld [vmem:[%s6372_s4 + $0x4] ss:$0 sm:$0xff] }
 0xadc   :  { %v1456_v51 = vpop.xlane.xlu1 %1455 }
 0xadd   :  { %5693 = vpow2.f32 %v1293_v49  ;;  %v1457_v53 = vsub.f32 %v1450_v44, %v1456_v51 }
 0xadf   :  { %v1458_v54 = vmul.f32 1.442695, %v1457_v53 }
 0xae0   :  { %v1466_v10 = vpop.permute.xlu1 %1465 }
 0xae1   :  { %5695 = vpow2.f32 %v1458_v54 }
 0xae7   :  { %v5694_v55 = vpop.eup %5693 }
 0xae8   :  { %v1295_v56 = vsel %vm650_vm10, %v5694_v55, 0.0 }
 0xae9   :  { %1296 = vadd.xlane.f32.xlu0 %v1295_v56  ;;  %v2503_v56 = vrot.slane %v2483_v46, 3 }
 0xaeb   :  { %v5696_v58 = vpop.eup %5695 }
 0xaec   :  { %v1460_v59 = vsel %vm650_vm10, %v5696_v58, 0.0 }
 0xaed   :  { %1461 = vadd.xlane.f32.xlu0 %v1460_v59 }
 0xb03   :  { %1300 = vrot.lane.b32.xlu0 %v1207_v35, %s5763_s16  ;;  %v2474_v35 = vld [vmem:[%s2473_s15] sm:$0x1]  ;;  %s2488_s15 = scalar_lea.vmem %s6370_s2, %s4595_s6 }
 0xb04   :  { %v2494_v39 = vrot.slane %v2474_v35, 6 }
 0xb06   :  { %v2512_v45 = vsel %vm480_vm2, %v2511_v40, %v2494_v39  ;;  %v6106_v39 = vpack.c.bf16 %v1923_v38, %v1922_v37  ;;  %v1998_v40 = vld [vmem:[#allocation5 + $0x420] sm:$0xff]  ;;  %v2389_v37 = vld [vmem:[#allocation5 + $0x4c8] sm:$0xff] }
 0xb07   :  { %v2513_v51 = vsel %vm482_vm3, %v2512_v45, %v2497_v43  ;;  %v2001_v45 = vld [vmem:[#allocation5 + $0x438] sm:$0xff] }
 0xb08   :  { %v2514_v59 = vsel %vm484_vm4, %v2513_v51, %v2500_v47  ;;  %v2076_v47 = vld [vmem:[#allocation5 + $0x440] sm:$0xff] }
 0xb76   :  { %v1297_v50 = vpop.xlane.xlu0 %1296 }
 0xb77   :  { %5697 = vrcp.f32 %v1297_v50 }
 0xb7a   :  { %v1462_v61 = vpop.xlane.xlu0 %1461 }
 0xb7b   :  { %5699 = vrcp.f32 %v1462_v61  ;;  %v2489_v61 = vld [vmem:[%s2488_s15] sm:$0x1] }
 0xb7e   :  { %v1301_v63 = vpop.permute.xlu0 %1300 }
 0xb7f   :  { %4997 = vmatpush3.msra.mxu1 %v1301_v63 }
 0xb80   :  { %5006 = vmatprep.subr.mxu1 %v5762_v6 }
 0xb81   :  { %v5698_v0 = vpop.eup %5697 }
 0xb82   :  { %v1299_v2 = vmul.f32 %v5698_v0, %v5694_v55  ;;  %v2486_v55 = vld [vmem:[%s2485_s11] sm:$0x1]  ;;  %v2515_v0 = vsel %vm486_vm5, %v2514_v59, %v2503_v56  ;;  %v2155_v59 = vld [vmem:[#allocation5 + $0x468] sm:$0xff] }
 0xb83   :  { %v2506_v63 = vrot.slane %v2486_v55, 2  ;;  %v2079_v55 = vld [vmem:[#allocation5 + $0x458] sm:$0xff] }
 0xb84   :  { %4999 = vmatmul.mubr.msk.f32.vlgmr.msra.gmra.mrb[18].mxu1 %vm650_vm10, %v1299_v2  ;;  %v2509_v2 = vrot.slane %v2489_v61, 1 }
 0xb85   :  { %v5700_v11 = vpop.eup %5699  ;;  %5007 = vmatpush3.msra.mxu1 %v1466_v10  ;;  %5008 = vmatprep.mubr.msk.f32.mxu1 %vm5761_vm0, %v5762_v6  ;;  %v2516_v5 = vsel %vm488_vm6, %v2515_v0, %v2506_v63  ;;  %v1773_v10 = vld [vmem:[#allocation5 + $0x3f8] sm:$0xff]  ;;  %v2156_v63 = vld [vmem:[#allocation5 + $0x470] sm:$0xff] }
 0xb86   :  { %v1464_v13 = vmul.f32 %v5700_v11, %v5696_v58  ;;  %5480 = vmatprep.subr.bf16.mxu1 %v5760_v3  ;;  %v2517_v8 = vsel %vm490_vm7, %v2516_v5, %v2509_v2  ;;  %v2157_v0 = vld [vmem:[#allocation5 + $0x478] sm:$0xff]  ;;  %v2232_v5 = vld [vmem:[#allocation5 + $0x480] sm:$0xff] }
 0xb87   :  { %v6142_v2 = vpack.c.bf16 %v2157_v0, %v2156_v63 }
 0xb88   :  { %5009 = vmatmul.mubr.msk.f32.vlgmr.msra.gmra.mrb[20].mxu1 %vm650_vm10, %v1464_v13  ;;  %v174_v13 = vld [vmem:[#allocation5 + $0x3c0] sm:$0xff] }
 0xb89   :  { %5482 = vmatpush3.bf16.msra.mxu1 %v5993_v12  ;;  %5022 = vmatprep.mubr.msk.f32.mxu1 %vm5761_vm0, %v5762_v6 }
 0xb8a   :  { %5489 = vmatprep.subr.bf16.mxu1 %v5760_v3 }
 0xc57   :  { %v1372_v18 = vpop.f32.mrb[18].mxu1 }
 0xc58   :  { %v5000_v19 = vpop.f32.mrb[19].mxu1  ;;  %5023 = vmatmul.mubr.msk.f32.vlgmr.msra.gmra.mrb[22].mxu1 %vm574_vm9, %v1372_v18  ;;  %v6079_v18 = vpack.c.bf16 %v175_v14, %v174_v13  ;;  %v2234_v13 = vld [vmem:[#allocation5 + $0x490] sm:$0xff]  ;;  %v2235_v14 = vld [vmem:[#allocation5 + $0x498] sm:$0xff] }
 0xc59   :  { %5044 = vmatprep.mubr.msk.f32.mxu1 %vm5761_vm0, %v5762_v6  ;;  %5491 = vmatpush3.bf16.msra.mxu1 %v6019_v32 }
 0xc5a   :  { %5492 = vmatprep.subr.bf16.mxu1 %v5760_v3 }
 0xc5b   :  { %v1537_v21 = vpop.f32.mrb[20].mxu1 }
 0xc5c   :  { %v5010_v22 = vpop.f32.mrb[21].mxu1  ;;  %5016 = vmatmul.mubr.msk.f32.vlgmr.msra.gmra.mrb[10].mxu0 %vm574_vm9, %v1537_v21 }
 0xc5d   :  { %5033 = vmatprep.mubr.msk.f32.mxu0 %vm5761_vm0, %v5762_v6  ;;  %5485 = vmatpush3.bf16.msra.mxu0 %v6011_v25  ;;  %v176_v22 = vld [vmem:[#allocation5 + $0x3d0] sm:$0xff] }
 0xc5e   :  { %5486 = vmatprep.subr.bf16.mxu0 %v5760_v3  ;;  %v6087_v24 = vpack.c.bf16 %v177_v23, %v176_v22  ;;  %v2311_v22 = vld [vmem:[#allocation5 + $0x4a8] sm:$0xff] }
 0xc61   :  { %5488 = vmatpush3.bf16.msra.mxu0 %v6015_v29 }
 0xc62   :  { %5543 = vmatprep.subr.bf16.mxu0 %v5760_v3 }
 0xd2b   :  { %v1683_v41 = vpop.f32.mrb[22].mxu1 }
 0xd2c   :  { %v5024_v44 = vpop.f32.mrb[23].mxu1 }
 0xd2d   :  { %v2000_v44 = vld [vmem:[#allocation5 + $0x430] sm:$0xff] }
 0xd2e   :  { %v6118_v46 = vpack.c.bf16 %v2001_v45, %v2000_v44 }
 0xd2f   :  { %v1610_v49 = vpop.f32.mrb[10].mxu0 }
 0xd30   :  { %v1684_v53 = vadd.f32 %v1683_v41, %v1610_v49  ;;  %v5017_v54 = vpop.f32.mrb[11].mxu0  ;;  %v1999_v41 = vld [vmem:[#allocation5 + $0x428] sm:$0xff] }
 0xd31   :  { %v6112_v42 = vpack.c.bf16 %v1999_v41, %v1998_v40  ;;  %v2077_v49 = vld [vmem:[#allocation5 + $0x448] sm:$0xff]  ;;  %v2078_v54 = vld [vmem:[#allocation5 + $0x450] sm:$0xff] }
 0xd32   :  { %v1691_v58 = vadd.f32 %v6049_v48, %v1684_v53  ;;  %v6124_v51 = vpack.c.bf16 %v2077_v49, %v2076_v47  ;;  %v6130_v56 = vpack.c.bf16 %v2079_v55, %v2078_v54  ;;  %v2390_v41 = vld [vmem:[#allocation5 + $0x4d0] sm:$0xff] }
 0xd34   :  { %v1692_v50 = vmax.f32 %v1691_v58, 0.0  ;;  %v2154_v58 = vld [vmem:[#allocation5 + $0x460] sm:$0xff] }
 0xd36   :  { %5034 = vmatmul.mubr.msk.f32.vlgmr.msra.gmra.mrb[12].mxu0 %vm496_vm8, %v1692_v50  ;;  %v6136_v50 = vpack.c.bf16 %v2155_v59, %v2154_v58 }
 0xd37   :  { %5545 = vmatpush3.bf16.msra.mxu0 %v5815_v4  ;;  %5143 = vmatprep.mubr.msk.f32.mxu0 %vm5761_vm0, %v5762_v6  ;;  %v1772_v4 = vld [vmem:[#allocation5 + $0x3f0] sm:$0xff] }
 0xd38   :  { %5546 = vmatprep.subr.bf16.mxu0 %v5760_v3  ;;  %v6070_v11 = vpack.c.bf16 %v1773_v10, %v1772_v4 }
 0xd3a   :  { %5494 = vmatpush3.bf16.msra.mxu1 %v6070_v11 }
 0xd3b   :  { %5548 = vmatpush3.bf16.msra.mxu0 %v5820_v7  ;;  %5495 = vmatprep.subr.bf16.mxu1 %v5760_v3  ;;  %v6077_v7 = vld [vmem:[%s6372_s4 + $0x5] ss:$0 sm:$0xff] }
 0xd3c   :  { %5146 = vmatprep.subr.mxu0 %v5762_v6 }
 0xd3e   :  { %5144 = vmatmul.mubr.msk.f32.vlgmr.msra.gmra.mrb[14].mxu0 %vm496_vm8, %v2517_v8  ;;  %v2233_v8 = vld [vmem:[#allocation5 + $0x488] sm:$0xff] }
 0xd3f   :  { %5148 = vmatprep.mubr.msk.f32.mxu0 %vm5761_vm0, %v5762_v6  ;;  %v6148_v4 = vpack.c.bf16 %v2233_v8, %v2232_v5 }
 0xe09   :  { %v1766_v15 = vpop.f32.mrb[12].mxu0 }
 0xe0a   :  { %v6082_v19 = vadd.f32 %v6077_v7, %v1766_v15  ;;  %v5035_v21 = vpop.f32.mrb[13].mxu0  ;;  %v6154_v15 = vpack.c.bf16 %v2235_v14, %v2234_v13 }
 0xe0b   :  { %v2310_v21 = vld [vmem:[#allocation5 + $0x4a0] sm:$0xff] }
 0xe0c   :  { %5045 = vmatmul.mubr.msk.f32.vlgmr.msra.gmra.mrb[24].mxu1 %vm496_vm8, %v6082_v19  ;;  %v1924_v43 = vrot.slane %v6082_v19, 1  ;;  %v2002_v53 = vrot.slane %v6082_v19, 2  ;;  %v2080_v61 = vrot.slane %v6082_v19, 3  ;;  %v2158_v10 = vrot.slane %v6082_v19, 4 }
 0xe0d   :  { %5497 = vmatpush3.bf16.msra.mxu1 %v6079_v18  ;;  %5055 = vmatprep.mubr.msk.f32.mxu1 %vm5761_vm0, %v5762_v6  ;;  %v6160_v23 = vpack.c.bf16 %v2311_v22, %v2310_v21  ;;  %v2236_v26 = vrot.slane %v6082_v19, 5  ;;  %v2314_v40 = vrot.slane %v6082_v19, 6  ;;  %v2392_v45 = vrot.slane %v6082_v19, 7 }
 0xe0e   :  { %5498 = vmatprep.subr.bf16.mxu1 %v5760_v3 }
 0xe11   :  { %v2587_v30 = vpop.f32.mrb[14].mxu0  ;;  %5500 = vmatpush3.bf16.msra.mxu1 %v6087_v24 }
 0xe12   :  { %v6098_v35 = vadd.f32 %v5717_v34, %v2587_v30  ;;  %v5145_v36 = vpop.f32.mrb[15].mxu0  ;;  %5501 = vmatprep.subr.bf16.mxu1 %v5760_v3  ;;  %v2313_v30 = vld [vmem:[#allocation5 + $0x4b8] sm:$0xff] }
 0xe13   :  { %v6166_v34 = vpack.c.bf16 %v2313_v30, %v2312_v27  ;;  %v2388_v36 = vld [vmem:[#allocation5 + $0x4c0] sm:$0xff] }
 0xe14   :  { %2593 = vrot.lane.b32.xlu0 %v6098_v35, %s5764_s17  ;;  %5056 = vmatmul.mubr.msk.f32.vlgmr.msra.gmra.mrb[24].mxu1 %vm496_vm8, %v5940_v17  ;;  %v6172_v38 = vpack.c.bf16 %v2389_v37, %v2388_v36  ;;  %v2591_v49 = vmul.f32 0.25, %v6098_v35 }
 0xe15   :  { %5503 = vmatpush3.bf16.msra.mxu1 %v6093_v31  ;;  %5066 = vmatprep.mubr.msk.f32.mxu1 %vm5761_vm0, %v5762_v6 }
 0xe16   :  { %5504 = vmatprep.subr.bf16.mxu1 %v5760_v3 }
 0xe19   :  { %5506 = vmatpush3.bf16.msra.mxu1 %v6106_v39 }
 0xe1a   :  { %5507 = vmatprep.subr.bf16.mxu1 %v5760_v3 }
 0xe1c   :  { %5067 = vmatmul.mubr.msk.f32.vlgmr.msra.gmra.mrb[24].mxu1 %vm496_vm8, %v1924_v43  ;;  %v2391_v43 = vld [vmem:[#allocation5 + $0x4d8] sm:$0xff] }
 0xe1d   :  { %5509 = vmatpush3.bf16.msra.mxu1 %v6112_v42  ;;  %5077 = vmatprep.mubr.msk.f32.mxu1 %vm5761_vm0, %v5762_v6  ;;  %v6178_v44 = vpack.c.bf16 %v2391_v43, %v2390_v41 }
 0xe1e   :  { %5510 = vmatprep.subr.bf16.mxu1 %v5760_v3 }
 0xe21   :  { %5512 = vmatpush3.bf16.msra.mxu1 %v6118_v46 }
 0xe22   :  { %5513 = vmatprep.subr.bf16.mxu1 %v5760_v3 }
 0xe24   :  { %5078 = vmatmul.mubr.msk.f32.vlgmr.msra.gmra.mrb[24].mxu1 %vm496_vm8, %v2002_v53 }
 0xe25   :  { %5515 = vmatpush3.bf16.msra.mxu1 %v6124_v51  ;;  %5088 = vmatprep.mubr.msk.f32.mxu1 %vm5761_vm0, %v5762_v6 }
 0xe26   :  { %5516 = vmatprep.subr.bf16.mxu1 %v5760_v3 }
 0xe29   :  { %5518 = vmatpush3.bf16.msra.mxu1 %v6130_v56 }
 0xe2a   :  { %5519 = vmatprep.subr.bf16.mxu1 %v5760_v3 }
 0xe2c   :  { %5089 = vmatmul.mubr.msk.f32.vlgmr.msra.gmra.mrb[24].mxu1 %vm496_vm8, %v2080_v61 }
 0xe2d   :  { %5521 = vmatpush3.bf16.msra.mxu1 %v6136_v50  ;;  %5099 = vmatprep.mubr.msk.f32.mxu1 %vm5761_vm0, %v5762_v6 }
 0xe2e   :  { %5522 = vmatprep.subr.bf16.mxu1 %v5760_v3 }
 0xe31   :  { %5524 = vmatpush3.bf16.msra.mxu1 %v6142_v2 }
 0xe32   :  { %5525 = vmatprep.subr.bf16.mxu1 %v5760_v3 }
 0xe34   :  { %5100 = vmatmul.mubr.msk.f32.vlgmr.msra.gmra.mrb[24].mxu1 %vm496_vm8, %v2158_v10 }
 0xe35   :  { %5527 = vmatpush3.bf16.msra.mxu1 %v6148_v4  ;;  %5110 = vmatprep.mubr.msk.f32.mxu1 %vm5761_vm0, %v5762_v6 }
 0xe36   :  { %5528 = vmatprep.subr.bf16.mxu1 %v5760_v3 }
 0xe39   :  { %5530 = vmatpush3.bf16.msra.mxu1 %v6154_v15 }
 0xe3a   :  { %5531 = vmatprep.subr.bf16.mxu1 %v5760_v3 }
 0xe3c   :  { %5111 = vmatmul.mubr.msk.f32.vlgmr.msra.gmra.mrb[24].mxu1 %vm496_vm8, %v2236_v26 }
 0xe3d   :  { %5533 = vmatpush3.bf16.msra.mxu1 %v6160_v23  ;;  %5121 = vmatprep.mubr.msk.f32.mxu1 %vm5761_vm0, %v5762_v6 }
 0xe3e   :  { %5534 = vmatprep.subr.bf16.mxu1 %v5760_v3 }
 0xe41   :  { %5536 = vmatpush3.bf16.msra.mxu1 %v6166_v34 }
 0xe42   :  { %5537 = vmatprep.subr.bf16.mxu1 %v5760_v3 }
 0xe44   :  { %5122 = vmatmul.mubr.msk.f32.vlgmr.msra.gmra.mrb[24].mxu1 %vm496_vm8, %v2314_v40 }
 0xe45   :  { %5539 = vmatpush3.bf16.msra.mxu1 %v6172_v38  ;;  %5132 = vmatprep.mubr.msk.f32.mxu1 %vm5761_vm0, %v5762_v6 }
 0xe46   :  { %5540 = vmatprep.subr.bf16.mxu1 %v5760_v3 }
 0xe49   :  { %5542 = vmatpush3.bf16.msra.mxu1 %v6178_v44 }
 0xe4a   :  { %5570 = vmatprep.subr.bf16.mxu1 %v5760_v3 }
 0xe4c   :  { %5133 = vmatmul.mubr.msk.f32.vlgmr.msra.gmra.mrb[24].mxu1 %vm496_vm8, %v2392_v45 }
 0xe4d   :  { %5572 = vmatpush3.bf16.msra.mxu1 %v5993_v12  ;;  %5233 = vmatprep.mubr.msk.f32.mxu1 %vm5761_vm0, %v5762_v6 }
 0xe4e   :  { %5579 = vmatprep.subr.bf16.mxu1 %v5760_v3 }
 0xe86   :  { %v2594_v47 = vpop.permute.xlu0 %2593 }
 0xe87   :  { %5147 = vmatpush3.xpose.msk.msra.mxu0 %vm574_vm9, %v2594_v47 }
 0xe88   :  { %5151 = vmatprep.subr.mxu0 %v5762_v6 }
 0xe8a   :  { %5149 = vmatmul.mubr.msk.f32.vlgmr.msra.gmra.mrb[16].mxu0 %vm574_vm9, %v2591_v49 }
 0xe8b   :  { %5153 = vmatprep.mubr.msk.f32.mxu0 %vm5761_vm0, %v5762_v6 }
 0xf1f   :  { %v6197_v19 = vpop.f32.mrb[24].mxu1 }
 0xf20   :  { %v5134_v12 = vpop.f32.mrb[25].mxu1 }
 0xf5d   :  { %v2666_v53 = vpop.f32.mrb[16].mxu0 }
 0xf5e   :  { %v5150_v54 = vpop.f32.mrb[17].mxu0  ;;  %v2670_v55 = vsel %vm650_vm10, %v2666_v53, -inf }
 0xf5f   :  { %2671 = vmax.xlane.f32.xlu0 %v2670_v55 }
 0xf75   :  { %2681 = vrot.lane.b32.xlu0 %v6098_v35, %s5763_s16 }
 0xf79   :  { %2757 = vrot.lane.b32.xlu0 %v2591_v49, %s5766_s20 }
 0xfec   :  { %v2672_v58 = vpop.xlane.xlu0 %2671 }
 0xfed   :  { %v2673_v59 = vsub.f32 %v2666_v53, %v2672_v58 }
 0xfef   :  { %v2674_v61 = vmul.f32 1.442695, %v2673_v59 }
 0xff0   :  { %v2682_v63 = vpop.permute.xlu0 %2681 }
 0xff1   :  { %5701 = vpow2.f32 %v2674_v61  ;;  %5152 = vmatpush3.msra.mxu0 %v2682_v63 }
 0xff2   :  { %5156 = vmatprep.subr.mxu0 %v5762_v6 }
 0xff4   :  { %v2758_v21 = vpop.permute.xlu0 %2757 }
 0xffb   :  { %v5702_v0 = vpop.eup %5701 }
 0xffc   :  { %v2676_v5 = vsel %vm650_vm10, %v5702_v0, 0.0 }
 0xffd   :  { %2677 = vadd.xlane.f32.xlu1 %v2676_v5 }
0x100e   :  { %2759 = vrot.lane.b32.xlu1 %v6098_v35, %s5765_s19 }
0x108a   :  { %v2678_v8 = vpop.xlane.xlu1 %2677 }
0x108b   :  { %5703 = vrcp.f32 %v2678_v8 }
0x108e   :  { %v2760_v14 = vpop.permute.xlu1 %2759 }
0x1095   :  { %v5704_v10 = vpop.eup %5703 }
0x1096   :  { %v2680_v13 = vmul.f32 %v5704_v10, %v5702_v0 }
0x1098   :  { %5154 = vmatmul.mubr.msk.f32.vlgmr.msra.gmra.mrb[18].mxu0 %vm650_vm10, %v2680_v13 }
0x1099   :  { %5157 = vmatpush3.xpose.msk.msra.mxu0 %vm574_vm9, %v2760_v14  ;;  %5158 = vmatprep.mubr.msk.f32.mxu0 %vm5761_vm0, %v5762_v6 }
0x109a   :  { %5161 = vmatprep.subr.mxu0 %v5762_v6 }
0x109c   :  { %5159 = vmatmul.mubr.msk.f32.vlgmr.msra.gmra.mrb[20].mxu0 %vm574_vm9, %v2758_v21 }
0x109d   :  { %5163 = vmatprep.mubr.msk.f32.mxu0 %vm5761_vm0, %v5762_v6 }
0x116b   :  { %v2753_v22 = vpop.f32.mrb[18].mxu0 }
0x116c   :  { %v5155_v26 = vpop.f32.mrb[19].mxu0 }
0x116f   :  { %v2831_v27 = vpop.f32.mrb[20].mxu0 }
0x1170   :  { %v5160_v30 = vpop.f32.mrb[21].mxu0  ;;  %v2835_v36 = vsel %vm650_vm10, %v2831_v27, -inf }
0x1171   :  { %2836 = vmax.xlane.f32.xlu1 %v2835_v36 }
0x11fe   :  { %v2837_v37 = vpop.xlane.xlu1 %2836 }
0x11ff   :  { %v2838_v40 = vsub.f32 %v2831_v27, %v2837_v37 }
0x1201   :  { %v2839_v41 = vmul.f32 1.442695, %v2838_v40 }
0x1203   :  { %5705 = vpow2.f32 %v2839_v41 }
0x120d   :  { %v5706_v43 = vpop.eup %5705 }
0x120e   :  { %v2841_v45 = vsel %vm650_vm10, %v5706_v43, 0.0 }
0x120f   :  { %2842 = vadd.xlane.f32.xlu0 %v2841_v45 }
0x1225   :  { %2846 = vrot.lane.b32.xlu0 %v6098_v35, %s5767_s21 }
0x129c   :  { %v2843_v47 = vpop.xlane.xlu0 %2842 }
0x129d   :  { %5707 = vrcp.f32 %v2843_v47 }
0x12a0   :  { %v2847_v49 = vpop.permute.xlu0 %2846 }
0x12a1   :  { %5162 = vmatpush3.msra.mxu0 %v2847_v49 }
0x12a2   :  { %5549 = vmatprep.subr.bf16.mxu0 %v5760_v3 }
0x12a7   :  { %v5708_v12 = vpop.eup %5707 }
0x12a8   :  { %v2845_v53 = vmul.f32 %v5708_v12, %v5706_v43 }
0x12aa   :  { %5164 = vmatmul.mubr.msk.f32.vlgmr.msra.gmra.mrb[22].mxu0 %vm650_vm10, %v2845_v53 }
0x12ab   :  { %5551 = vmatpush3.bf16.msra.mxu0 %v5888_v1  ;;  %5170 = vmatprep.mubr.msk.f32.mxu0 %vm5761_vm0, %v5762_v6 }
0x12ac   :  { %5552 = vmatprep.subr.bf16.mxu0 %v5760_v3 }
0x137d   :  { %v2918_v54 = vpop.f32.mrb[22].mxu0 }
0x137e   :  { %v5165_v55 = vpop.f32.mrb[23].mxu0  ;;  %5171 = vmatmul.mubr.msk.f32.vlgmr.msra.gmra.mrb[24].mxu0 %vm574_vm9, %v2918_v54 }
0x137f   :  { %5554 = vmatpush3.bf16.msra.mxu0 %v5914_v52  ;;  %5177 = vmatprep.mubr.msk.f32.mxu0 %vm5761_vm0, %v5762_v6 }
0x1380   :  { %5555 = vmatprep.subr.bf16.mxu0 %v5760_v3 }
0x1382   :  { %5178 = vmatmul.mubr.msk.f32.vlgmr.msra.gmra.mrb[26].mxu0 %vm574_vm9, %v2753_v22 }
0x1383   :  { %5557 = vmatpush3.bf16.msra.mxu0 %v5925_v57  ;;  %5188 = vmatprep.mubr.msk.f32.mxu0 %vm5761_vm0, %v5762_v6 }
0x1384   :  { %5558 = vmatprep.subr.bf16.mxu0 %v5760_v3 }
0x1387   :  { %5560 = vmatpush3.bf16.msra.mxu0 %v5929_v60 }
0x1388   :  { %5561 = vmatprep.subr.bf16.mxu0 %v5760_v3 }
0x1451   :  { %v2991_v1 = vpop.f32.mrb[24].mxu0 }
0x1452   :  { %v5172_v52 = vpop.f32.mrb[25].mxu0 }
0x1455   :  { %v3064_v35 = vpop.f32.mrb[26].mxu0 }
0x1456   :  { %v3065_v58 = vadd.f32 %v3064_v35, %v2991_v1  ;;  %v5179_v59 = vpop.f32.mrb[27].mxu0 }
0x1458   :  { %v3068_v61 = vadd.f32 %v5945_v20, %v3065_v58 }
0x145a   :  { %v3069_v63 = vmax.f32 %v3068_v61, 0.0 }
0x145c   :  { %5189 = vmatmul.mubr.msk.f32.vlgmr.msra.gmra.mrb[28].mxu0 %vm496_vm8, %v3069_v63 }
0x145d   :  { %5563 = vmatpush3.bf16.msra.mxu0 %v5933_v62  ;;  %5199 = vmatprep.mubr.msk.f32.mxu0 %vm5761_vm0, %v5762_v6 }
0x145e   :  { %5564 = vmatprep.subr.bf16.mxu0 %v5760_v3 }
0x1461   :  { %5566 = vmatpush3.bf16.msra.mxu0 %v5951_v9 }
0x1462   :  { %5202 = vmatprep.subr.mxu0 %v5762_v6 }
0x152f   :  { %v3139_v57 = vpop.f32.mrb[28].mxu0 }
0x1530   :  { %v3140_v60 = vadd.f32 %v5958_v28, %v3139_v57  ;;  %v5190_v0 = vpop.f32.mrb[29].mxu0 }
0x1532   :  { %v3143_v5 = vmax.f32 %v3140_v60, 0.0 }
0x1534   :  { %5200 = vmatmul.mubr.msk.f32.vlgmr.msra.gmra.mrb[30].mxu0 %vm496_vm8, %v3143_v5 }
0x1535   :  { %5204 = vmatprep.mubr.msk.f32.mxu0 %vm5761_vm0, %v5762_v6 }
0x1607   :  { %v3213_v62 = vpop.f32.mrb[30].mxu0 }
0x1608   :  { %v3214_v20 = vadd.f32 %v5967_v33, %v3213_v62  ;;  %v5201_v8 = vpop.f32.mrb[31].mxu0 }
0x160a   :  { %3219 = vrot.lane.b32.xlu1 %v3214_v20, %s5764_s17  ;;  %v3217_v9 = vmul.f32 0.25, %v3214_v20 }
0x167c   :  { %v3220_v10 = vpop.permute.xlu1 %3219 }
0x167d   :  { %5203 = vmatpush3.xpose.msk.msra.mxu0 %vm574_vm9, %v3220_v10 }
0x167e   :  { %5207 = vmatprep.subr.mxu0 %v5762_v6 }
0x1680   :  { %5205 = vmatmul.mubr.msk.f32.vlgmr.msra.gmra.mrb[32].mxu0 %vm574_vm9, %v3217_v9 }
0x1681   :  { %5209 = vmatprep.mubr.msk.f32.mxu0 %vm5761_vm0, %v5762_v6 }
0x1753   :  { %v3292_v28 = vpop.f32.mrb[32].mxu0 }
0x1754   :  { %v5206_v13 = vpop.f32.mrb[33].mxu0  ;;  %v3296_v14 = vsel %vm650_vm10, %v3292_v28, -inf }
0x1755   :  { %3297 = vmax.xlane.f32.xlu1 %v3296_v14 }
0x1766   :  { %3385 = vrot.lane.b32.xlu1 %v3214_v20, %s5765_s19 }
0x176a   :  { %3383 = vrot.lane.b32.xlu1 %v3217_v9, %s5766_s20 }
0x17e2   :  { %v3298_v33 = vpop.xlane.xlu1 %3297 }
0x17e3   :  { %v3299_v21 = vsub.f32 %v3292_v28, %v3298_v33 }
0x17e5   :  { %v3300_v22 = vmul.f32 1.442695, %v3299_v21 }
0x17e6   :  { %v3386_v40 = vpop.permute.xlu1 %3385 }
0x17e7   :  { %5709 = vpow2.f32 %v3300_v22 }
0x17ea   :  { %v3384_v43 = vpop.permute.xlu1 %3383 }
0x17f1   :  { %v5710_v26 = vpop.eup %5709 }
0x17f2   :  { %v3302_v27 = vsel %vm650_vm10, %v5710_v26, 0.0 }
0x17f3   :  { %3303 = vadd.xlane.f32.xlu0 %v3302_v27 }
0x1809   :  { %3307 = vrot.lane.b32.xlu0 %v3214_v20, %s5763_s16 }
0x1880   :  { %v3304_v30 = vpop.xlane.xlu0 %3303 }
0x1881   :  { %5711 = vrcp.f32 %v3304_v30 }
0x1884   :  { %v3308_v36 = vpop.permute.xlu0 %3307 }
0x1885   :  { %5208 = vmatpush3.msra.mxu0 %v3308_v36 }
0x1886   :  { %5212 = vmatprep.subr.mxu0 %v5762_v6 }
0x188b   :  { %v5712_v37 = vpop.eup %5711 }
0x188c   :  { %v3306_v41 = vmul.f32 %v5712_v37, %v5710_v26 }
0x188e   :  { %5210 = vmatmul.mubr.msk.f32.vlgmr.msra.gmra.mrb[34].mxu0 %vm650_vm10, %v3306_v41 }
0x188f   :  { %5213 = vmatpush3.xpose.msk.msra.mxu0 %vm574_vm9, %v3386_v40  ;;  %5214 = vmatprep.mubr.msk.f32.mxu0 %vm5761_vm0, %v5762_v6 }
0x1890   :  { %5217 = vmatprep.subr.mxu0 %v5762_v6 }
0x1892   :  { %5215 = vmatmul.mubr.msk.f32.vlgmr.msra.gmra.mrb[36].mxu0 %vm574_vm9, %v3384_v43 }
0x1893   :  { %5219 = vmatprep.mubr.msk.f32.mxu0 %vm5761_vm0, %v5762_v6 }
0x1961   :  { %v3379_v45 = vpop.f32.mrb[34].mxu0 }
0x1962   :  { %v5211_v47 = vpop.f32.mrb[35].mxu0  ;;  %5234 = vmatmul.mubr.msk.f32.vlgmr.msra.gmra.mrb[26].mxu1 %vm574_vm9, %v3379_v45 }
0x1963   :  { %5581 = vmatpush3.bf16.msra.mxu1 %v6019_v32  ;;  %5255 = vmatprep.mubr.msk.f32.mxu1 %vm5761_vm0, %v5762_v6 }
0x1964   :  { %5582 = vmatprep.subr.bf16.mxu1 %v5760_v3 }
0x1965   :  { %v3457_v49 = vpop.f32.mrb[36].mxu0 }
0x1966   :  { %v5216_v12 = vpop.f32.mrb[37].mxu0  ;;  %v3461_v53 = vsel %vm650_vm10, %v3457_v49, -inf }
0x1967   :  { %3462 = vmax.xlane.f32.xlu0 %v3461_v53  ;;  %5584 = vmatpush3.bf16.msra.mxu1 %v6070_v11 }
0x1968   :  { %5585 = vmatprep.subr.bf16.mxu1 %v5760_v3 }
0x197d   :  { %3472 = vrot.lane.b32.xlu0 %v3214_v20, %s5767_s21 }
0x19f4   :  { %v3463_v54 = vpop.xlane.xlu0 %3462 }
0x19f5   :  { %v3464_v55 = vsub.f32 %v3457_v49, %v3463_v54 }
0x19f7   :  { %v3465_v1 = vmul.f32 1.442695, %v3464_v55 }
0x19f8   :  { %v3473_v32 = vpop.permute.xlu0 %3472 }
0x19f9   :  { %5713 = vpow2.f32 %v3465_v1  ;;  %5218 = vmatpush3.msra.mxu0 %v3473_v32 }
0x19fa   :  { %5567 = vmatprep.subr.bf16.mxu0 %v5760_v3 }
0x1a03   :  { %v5714_v52 = vpop.eup %5713 }
0x1a04   :  { %v3467_v35 = vsel %vm650_vm10, %v5714_v52, 0.0 }
0x1a05   :  { %3468 = vadd.xlane.f32.xlu1 %v3467_v35 }
0x1a35   :  { %v3690_v58 = vpop.f32.mrb[26].mxu1 }
0x1a36   :  { %v5235_v59 = vpop.f32.mrb[27].mxu1 }
0x1a92   :  { %v3469_v61 = vpop.xlane.xlu1 %3468 }
0x1a93   :  { %5715 = vrcp.f32 %v3469_v61 }
0x1a9d   :  { %v5716_v11 = vpop.eup %5715 }
0x1a9e   :  { %v3471_v63 = vmul.f32 %v5716_v11, %v5714_v52 }
0x1aa0   :  { %5220 = vmatmul.mubr.msk.f32.vlgmr.msra.gmra.mrb[38].mxu0 %vm650_vm10, %v3471_v63 }
0x1aa1   :  { %5569 = vmatpush3.bf16.msra.mxu0 %v6001_v16  ;;  %5226 = vmatprep.mubr.msk.f32.mxu0 %vm5761_vm0, %v5762_v6 }
0x1aa2   :  { %5573 = vmatprep.subr.bf16.mxu0 %v5760_v3 }
0x1b73   :  { %v3544_v57 = vpop.f32.mrb[38].mxu0 }
0x1b74   :  { %v5221_v60 = vpop.f32.mrb[39].mxu0  ;;  %5227 = vmatmul.mubr.msk.f32.vlgmr.msra.gmra.mrb[40].mxu0 %vm574_vm9, %v3544_v57 }
0x1b75   :  { %5575 = vmatpush3.bf16.msra.mxu0 %v6011_v25  ;;  %5244 = vmatprep.mubr.msk.f32.mxu0 %vm5761_vm0, %v5762_v6 }
0x1b76   :  { %5576 = vmatprep.subr.bf16.mxu0 %v5760_v3 }
0x1b79   :  { %5578 = vmatpush3.bf16.msra.mxu0 %v6015_v29  ;;  %v3842_v29 = vrot.slane %v5940_v17, 1 }
0x1b7a   :  { %5633 = vmatprep.subr.bf16.mxu0 %v5760_v3 }
0x1c47   :  { %v3617_v16 = vpop.f32.mrb[40].mxu0 }
0x1c48   :  { %v3691_v0 = vadd.f32 %v3690_v58, %v3617_v16  ;;  %v5228_v5 = vpop.f32.mrb[41].mxu0 }
0x1c4a   :  { %v3694_v62 = vadd.f32 %v6049_v48, %v3691_v0 }
0x1c4c   :  { %v3695_v20 = vmax.f32 %v3694_v62, 0.0 }
0x1c4e   :  { %5245 = vmatmul.mubr.msk.f32.vlgmr.msra.gmra.mrb[42].mxu0 %vm496_vm8, %v3695_v20 }
0x1c4f   :  { %5354 = vmatprep.mubr.msk.f32.mxu0 %vm5761_vm0, %v5762_v6 }
0x1d21   :  { %v3765_v25 = vpop.f32.mrb[42].mxu0 }
0x1d22   :  { %v3766_v8 = vadd.f32 %v6077_v7, %v3765_v25  ;;  %v5246_v10 = vpop.f32.mrb[43].mxu0 }
0x1d24   :  { %5256 = vmatmul.mubr.msk.f32.vlgmr.msra.gmra.mrb[28].mxu1 %vm496_vm8, %v3766_v8  ;;  %v3915_v48 = vrot.slane %v3766_v8, 1  ;;  %v3989_v17 = vrot.slane %v3766_v8, 2  ;;  %v4063_v7 = vrot.slane %v3766_v8, 3 }
0x1d25   :  { %5587 = vmatpush3.bf16.msra.mxu1 %v6079_v18  ;;  %5266 = vmatprep.mubr.msk.f32.mxu1 %vm5761_vm0, %v5762_v6  ;;  %v4137_v18 = vrot.slane %v3766_v8, 4 }
0x1d26   :  { %5588 = vmatprep.subr.bf16.mxu1 %v5760_v3 }
0x1d29   :  { %5590 = vmatpush3.bf16.msra.mxu1 %v6087_v24  ;;  %v4211_v24 = vrot.slane %v3766_v8, 5 }
0x1d2a   :  { %5591 = vmatprep.subr.bf16.mxu1 %v5760_v3 }
0x1d2c   :  { %5267 = vmatmul.mubr.msk.f32.vlgmr.msra.gmra.mrb[28].mxu1 %vm496_vm8, %v3842_v29 }
0x1d2d   :  { %5593 = vmatpush3.bf16.msra.mxu1 %v6093_v31  ;;  %5277 = vmatprep.mubr.msk.f32.mxu1 %vm5761_vm0, %v5762_v6  ;;  %v4285_v31 = vrot.slane %v3766_v8, 6 }
0x1d2e   :  { %5594 = vmatprep.subr.bf16.mxu1 %v5760_v3 }
0x1d31   :  { %5596 = vmatpush3.bf16.msra.mxu1 %v6106_v39  ;;  %v4359_v39 = vrot.slane %v3766_v8, 7 }
0x1d32   :  { %5597 = vmatprep.subr.bf16.mxu1 %v5760_v3 }
0x1d34   :  { %5278 = vmatmul.mubr.msk.f32.vlgmr.msra.gmra.mrb[28].mxu1 %vm496_vm8, %v3915_v48 }
0x1d35   :  { %5599 = vmatpush3.bf16.msra.mxu1 %v6112_v42  ;;  %5288 = vmatprep.mubr.msk.f32.mxu1 %vm5761_vm0, %v5762_v6  ;;  %v179_v42 = vld [vmem:[#allocation5 + $0x4e0] sm:$0xff] }
0x1d36   :  { %5600 = vmatprep.subr.bf16.mxu1 %v5760_v3 }
0x1d39   :  { %5602 = vmatpush3.bf16.msra.mxu1 %v6118_v46  ;;  %v180_v46 = vld [vmem:[#allocation5 + $0x4e8] sm:$0xff] }
0x1d3a   :  { %5603 = vmatprep.subr.bf16.mxu1 %v5760_v3 }
0x1d3c   :  { %5289 = vmatmul.mubr.msk.f32.vlgmr.msra.gmra.mrb[28].mxu1 %vm496_vm8, %v3989_v17 }
0x1d3d   :  { %5605 = vmatpush3.bf16.msra.mxu1 %v6124_v51  ;;  %5299 = vmatprep.mubr.msk.f32.mxu1 %vm5761_vm0, %v5762_v6  ;;  %v5634_v51 = vpack.c.bf16 %v180_v46, %v179_v42 }
0x1d3e   :  { %5606 = vmatprep.subr.bf16.mxu1 %v5760_v3 }
0x1d3f   :  { %5635 = vmatpush3.bf16.msra.mxu0 %v5634_v51 }
0x1d40   :  { %5636 = vmatprep.subr.bf16.mxu0 %v5760_v3 }
0x1d41   :  { %5608 = vmatpush3.bf16.msra.mxu1 %v6130_v56  ;;  %v181_v56 = vld [vmem:[#allocation5 + $0x4f0] sm:$0xff] }
0x1d42   :  { %5609 = vmatprep.subr.bf16.mxu1 %v5760_v3 }
0x1d44   :  { %5300 = vmatmul.mubr.msk.f32.vlgmr.msra.gmra.mrb[28].mxu1 %vm496_vm8, %v4063_v7 }
0x1d45   :  { %5611 = vmatpush3.bf16.msra.mxu1 %v6136_v50  ;;  %5310 = vmatprep.mubr.msk.f32.mxu1 %vm5761_vm0, %v5762_v6  ;;  %v182_v50 = vld [vmem:[#allocation5 + $0x4f8] sm:$0xff] }
0x1d46   :  { %5612 = vmatprep.subr.bf16.mxu1 %v5760_v3 }
0x1d49   :  { %5614 = vmatpush3.bf16.msra.mxu1 %v6142_v2  ;;  %v5637_v2 = vpack.c.bf16 %v182_v50, %v181_v56 }
0x1d4a   :  { %5615 = vmatprep.subr.bf16.mxu1 %v5760_v3 }
0x1d4b   :  { %5638 = vmatpush3.bf16.msra.mxu0 %v5637_v2 }
0x1d4c   :  { %5311 = vmatmul.mubr.msk.f32.vlgmr.msra.gmra.mrb[28].mxu1 %vm496_vm8, %v4137_v18 }
0x1d4d   :  { %5617 = vmatpush3.bf16.msra.mxu1 %v6148_v4  ;;  %5321 = vmatprep.mubr.msk.f32.mxu1 %vm5761_vm0, %v5762_v6 }
0x1d4e   :  { %5618 = vmatprep.subr.bf16.mxu1 %v5760_v3 }
0x1d51   :  { %5620 = vmatpush3.bf16.msra.mxu1 %v6154_v15 }
0x1d52   :  { %5621 = vmatprep.subr.bf16.mxu1 %v5760_v3 }
0x1d54   :  { %5322 = vmatmul.mubr.msk.f32.vlgmr.msra.gmra.mrb[28].mxu1 %vm496_vm8, %v4211_v24 }
0x1d55   :  { %5623 = vmatpush3.bf16.msra.mxu1 %v6160_v23  ;;  %5332 = vmatprep.mubr.msk.f32.mxu1 %vm5761_vm0, %v5762_v6 }
0x1d56   :  { %5624 = vmatprep.subr.bf16.mxu1 %v5760_v3 }
0x1d59   :  { %5626 = vmatpush3.bf16.msra.mxu1 %v6166_v34 }
0x1d5a   :  { %5627 = vmatprep.subr.bf16.mxu1 %v5760_v3 }
0x1d5c   :  { %5333 = vmatmul.mubr.msk.f32.vlgmr.msra.gmra.mrb[28].mxu1 %vm496_vm8, %v4285_v31 }
0x1d5d   :  { %5629 = vmatpush3.bf16.msra.mxu1 %v6172_v38  ;;  %5343 = vmatprep.mubr.msk.f32.mxu1 %vm5761_vm0, %v5762_v6  ;;  %v4625_v6 = vld [vmem:[%s6372_s4 + $0x7] ss:$0 sm:$0xff] }
0x1d5e   :  { %5630 = vmatprep.subr.bf16.mxu1 %v5760_v3  ;;  %v4626_v3 = vld [vmem:[%s6372_s4 + $0x8] ss:$0 sm:$0xff] }
0x1d61   :  { %5632 = vmatpush3.bf16.msra.mxu1 %v6178_v44 }
0x1d64   :  { %5344 = vmatmul.mubr.msk.f32.vlgmr.msra.gmra.mrb[28].mxu1 %vm496_vm8, %v4359_v39 }
0x1e37   :  { %v4428_v4 = vpop.f32.mrb[28].mxu1 }
0x1e38   :  { %v4434_v15 = vrot.slane %v4428_v4, 7  ;;  %v5345_v23 = vpop.f32.mrb[29].mxu1 }
0x1e3a   :  { %v4436_v34 = vsel %vm478_vm1, %v6197_v19, %v4434_v15 }
0x1e3b   :  { %v4441_v38 = vadd.f32 %v4625_v6, %v4436_v34 }
0x1e3d   :  { %v4442_v44 = vmax.f32 %v4441_v38, 0.0 }
0x1e3f   :  { %5355 = vmatmul.mubr.msk.f32.vlgmr.msra.gmra.mrb[44].mxu0 %vm496_vm8, %v4442_v44 }
0x1f12   :  { %v4516_v9 = vpop.f32.mrb[44].mxu0 }
0x1f13   :  { %v4517_v28 = vadd.f32 %v4626_v3, %v4516_v9  ;;  %v5356_v13 = vpop.f32.mrb[45].mxu0 }
0x1f15   :  { %4521 = vst.msk [vmem:[%s6373_s5] sm:$0x3] %vm4520_vm11, %v4517_v28 }
0x1f16   :  { %4526 = vsyncpa [#allocation3], 1 }
0x1f17   :  { %4527 = vsyncpa [#allocation4], 1 }

</bundles_post_ra>
